<compile_context>
chip_gen: v5e
topology: v5e:2x2
jax: 0.10.0
libtpu: 0.0.40
codegen_flags: <defaults>
</compile_context>

<pallas_src>
import math
import numpy as np
import jax
import jax.numpy as jnp
from jax.experimental import pallas as pl
from jax.experimental.pallas import tpu as pltpu

# ------------------------- model configuration ------------------------------
SEQ_LEN  = 8
BATCH    = 2
DIM_FACE = 16
DIM_POSE = 8
DIM_IN   = DIM_FACE + DIM_POSE        # 24
DIM_V    = 64
DIM_HID  = DIM_IN                     # = dim_in because not (use_q and use_kv)
NUM_CLS  = 5

# ----------------------------- padded layout ---------------------------------
LANE  = 128
B_PAD = 8            # batch padded to one full sublane group
D_PAD = LANE         # input feature dim padded to lane width
H_PAD = LANE         # hidden dim padded to lane width
V_PAD = LANE         # value dim padded to lane width
C_PAD = LANE         # class dim padded to lane width
NEG   = -1e30        # "minus infinity" for masking / padded logits


# ------------------------------- kernel -------------------------------------
def rag_kernel(x_ref, h0_ref, wih_ref, bi_ref, whh_ref, bhh_ref,
               wkv_ref, bkv_ref, wm_ref, bm_ref, out_ref):
    Bp = h0_ref.shape[0]               # 8   (padded batch)
    Hp = h0_ref.shape[1]               # 128 (padded hidden)
    TB = x_ref.shape[0]                # T * Bp
    T  = TB // Bp

    x_all = x_ref[...]                                                     # (TB, 128)

    # ---- hoisted input-side projections: ONE matmul each over the whole sequence ----
    gi_all = jnp.dot(x_all, wih_ref[...],
                     preferred_element_type=jnp.float32) + bi_ref[...]     # (TB, 3*Hp)
    kv_all = jnp.dot(x_all, wkv_ref[...],
                     preferred_element_type=jnp.float32) + bkv_ref[...]    # (TB, Hp+Vp)

    w_hh = whh_ref[...]                                                    # (Hp, 3*Hp)
    b_hh = bhh_ref[...]                                                    # (1, 3*Hp)

    # ---- GRU recurrence: only h @ W_hh stays inside the loop (static unroll, T=8) ----
    h = h0_ref[...]                                                        # (Bp, Hp)
    for t in range(T):
        gi = gi_all[t * Bp:(t + 1) * Bp, :]                                # (Bp, 3*Hp)
        gh = jnp.dot(h, w_hh, preferred_element_type=jnp.float32) + b_hh   # (Bp, 3*Hp)
        rz = jax.nn.sigmoid(gi[:, :2 * Hp] + gh[:, :2 * Hp])               # one sigmoid
        r = rz[:, :Hp]
        z = rz[:, Hp:]
        n = jnp.tanh(gi[:, 2 * Hp:] + r * gh[:, 2 * Hp:])
        h = (1.0 - z) * n + z * h                                          # (Bp, Hp)

    # ---- attention: scores = (h . K_t)/sqrt(H), softmax over time, result = att @ V ----
    k_all = kv_all[:, :Hp]                                                 # (TB, Hp)
    v_all = kv_all[:, Hp:]                                                 # (TB, Vp)
    scale = 1.0 / math.sqrt(float(DIM_HID))                                # unpadded H

    # S[b, j] = h[b] . k_flat[j]; only j with (j mod Bp == b) belong to batch b.
    s = jax.lax.dot_general(h, k_all, (((1,), (1,)), ((), ())),
                            preferred_element_type=jnp.float32) * scale    # (Bp, TB)
    col = jax.lax.broadcasted_iota(jnp.int32, s.shape, 1)
    row = jax.lax.broadcasted_iota(jnp.int32, s.shape, 0)
    valid = jax.lax.bitwise_and(col, Bp - 1) == row                        # Bp is pow2
    s = jnp.where(valid, s, NEG)

    m = jnp.max(s, axis=1, keepdims=True)
    e = jnp.exp(s - m)
    denom = jnp.sum(e, axis=1, keepdims=True)
    att = e * pl.reciprocal(denom, approx=True)                            # (Bp, TB)

    result = jnp.dot(att, v_all, preferred_element_type=jnp.float32)       # (Bp, Vp)
    result = jnp.maximum(result, 0.0)                                      # ReLU

    logits = jnp.dot(result, wm_ref[...],
                     preferred_element_type=jnp.float32) + bm_ref[...]     # (Bp, Cp)
    mo = jnp.max(logits, axis=1, keepdims=True)
    lse = jnp.log(jnp.sum(jnp.exp(logits - mo), axis=1, keepdims=True)) + mo
    out_ref[...] = (logits - lse).astype(out_ref.dtype)                    # log_softmax


# ------------------------------- wrapper -------------------------------------
def _pad2(a, rows, cols, fill=0.0):
    out = jnp.full((rows, cols), fill, jnp.float32)
    return out.at[:a.shape[0], :a.shape[1]].set(a)


def recurrent_attention_gru(inp_btd, h0, p):
    """inp_btd: (B, T, dim_in); h0: (B, dim_hid). Returns (log-probs (B, num_cls), batch)."""
    B, T, D = inp_btd.shape

    # Time-major, batch padded to a full sublane, features lane-dense, flattened.
    x = jnp.zeros((T, B_PAD, D_PAD), jnp.float32)
    x = x.at[:, :B, :D].set(jnp.transpose(inp_btd, (1, 0, 2)))
    x_flat = x.reshape(T * B_PAD, D_PAD)                                   # (T*Bp, 128)

    h0_p = _pad2(h0, B_PAD, H_PAD)                                         # (8, 128)

    # Fused, zero-padded weights (pad rows/cols = 0 keeps the math exact; h pad cols stay 0).
    w_ih = jnp.concatenate([_pad2(p["wir"], D_PAD, H_PAD),
                            _pad2(p["wiz"], D_PAD, H_PAD),
                            _pad2(p["win"], D_PAD, H_PAD)], axis=1)        # (128, 384)
    b_i  = jnp.concatenate([_pad2(p["br"], 1, H_PAD),
                            _pad2(p["bz"], 1, H_PAD),
                            _pad2(p["bin"], 1, H_PAD)], axis=1)            # (1, 384)
    w_hh = jnp.concatenate([_pad2(p["whr"], H_PAD, H_PAD),
                            _pad2(p["whz"], H_PAD, H_PAD),
                            _pad2(p["whn"], H_PAD, H_PAD)], axis=1)        # (128, 384)
    b_hh = jnp.concatenate([jnp.zeros((1, 2 * H_PAD), jnp.float32),
                            _pad2(p["bhn"], 1, H_PAD)], axis=1)            # (1, 384)
    w_kv = jnp.concatenate([_pad2(p["wk"], D_PAD, H_PAD),
                            _pad2(p["wv"], D_PAD, V_PAD)], axis=1)         # (128, 256)
    b_kv = jnp.concatenate([_pad2(p["bk"], 1, H_PAD),
                            _pad2(p["bv"], 1, V_PAD)], axis=1)             # (1, 256)
    w_m  = _pad2(p["wm"], V_PAD, C_PAD)                                    # (128, 128)
    b_m  = _pad2(p["bm"], 1, C_PAD, fill=NEG)   # padded classes -> -inf logits

    vmem = pl.BlockSpec(memory_space=pltpu.MemorySpace.VMEM)
    args = (x_flat, h0_p, w_ih, b_i, w_hh, b_hh, w_kv, b_kv, w_m, b_m)
    out = pl.pallas_call(
        rag_kernel,
        out_shape=jax.ShapeDtypeStruct((B_PAD, C_PAD), jnp.float32),
        in_specs=[vmem] * len(args),
        out_specs=vmem,
    )(*args)
    return out[:B, :NUM_CLS], B


# --------------------------- deterministic params ----------------------------
def init_params(key):
    ks = jax.random.split(key, 16)
    kgru = 1.0 / math.sqrt(DIM_HID)
    klin = 1.0 / math.sqrt(DIM_IN)
    kmlp = 1.0 / math.sqrt(DIM_V)
    u = lambda k, shape, b: jax.random.uniform(k, shape, jnp.float32, -b, b)
    return {
        # GRU input->hidden / hidden->hidden weights, transposed to (in, out)
        "wir": u(ks[0], (DIM_IN, DIM_HID), kgru),
        "wiz": u(ks[1], (DIM_IN, DIM_HID), kgru),
        "win": u(ks[2], (DIM_IN, DIM_HID), kgru),
        "whr": u(ks[3], (DIM_HID, DIM_HID), kgru),
        "whz": u(ks[4], (DIM_HID, DIM_HID), kgru),
        "whn": u(ks[5], (DIM_HID, DIM_HID), kgru),
        "br":  u(ks[6], (1, DIM_HID), kgru),   # b_ir + b_hr folded
        "bz":  u(ks[7], (1, DIM_HID), kgru),   # b_iz + b_hz folded
        "bin": u(ks[8], (1, DIM_HID), kgru),   # b_in
        "bhn": u(ks[9], (1, DIM_HID), kgru),   # b_hn (stays inside r * (...))
        # WK / WV / MLP linears (transposed)
        "wk":  u(ks[10], (DIM_IN, DIM_HID), klin),
        "bk":  u(ks[11], (1, DIM_HID), klin),
        "wv":  u(ks[12], (DIM_IN, DIM_V), klin),
        "bv":  u(ks[13], (1, DIM_V), klin),
        "wm":  u(ks[14], (DIM_V, NUM_CLS), kmlp),
        "bm":  u(ks[15], (1, NUM_CLS), kmlp),
    }


# ----------------------------- numpy reference --------------------------------
def reference_forward(inp_btd, h0, p):
    sig = lambda x: 1.0 / (1.0 + np.exp(-x))
    B, T, _ = inp_btd.shape
    H = h0.shape[1]
    h = h0.copy()
    for t in range(T):
        x = inp_btd[:, t, :]
        r = sig(x @ p["wir"] + h @ p["whr"] + p["br"])
        z = sig(x @ p["wiz"] + h @ p["whz"] + p["bz"])
        n = np.tanh(x @ p["win"] + p["bin"] + r * (h @ p["whn"] + p["bhn"]))
        h = (1.0 - z) * n + z * h
    k = inp_btd @ p["wk"] + p["bk"]                       # (B, T, H)
    v = inp_btd @ p["wv"] + p["bv"]                       # (B, T, DV)
    scores = np.einsum("bh,bth->bt", h, k) / math.sqrt(H)
    scores = scores - scores.max(axis=1, keepdims=True)
    att = np.exp(scores) / np.exp(scores).sum(axis=1, keepdims=True)
    result = np.einsum("bt,btd->bd", att, v)
    result = np.maximum(result, 0.0)
    logits = result @ p["wm"] + p["bm"]
    mo = logits.max(axis=1, keepdims=True)
    lse = np.log(np.exp(logits - mo).sum(axis=1, keepdims=True)) + mo
    return logits - lse


# ---------------------------------- main --------------------------------------
if __name__ == "__main__":
    key = jax.random.PRNGKey(0)
    k_face, k_pose, k_h0, k_par = jax.random.split(key, 4)

    # Module inputs: face (B*T, dim_face), pose (B*T, dim_pose)
    face = jax.random.normal(k_face, (BATCH * SEQ_LEN, DIM_FACE), jnp.float32)
    pose = jax.random.normal(k_pose, (BATCH * SEQ_LEN, DIM_POSE), jnp.float32)
    # torch.randn((1, B, dim_hid)) / 100 -> deterministic equivalent
    h0 = jax.random.normal(k_h0, (BATCH, DIM_HID), jnp.float32) / 100.0

    params = init_params(k_par)

    # Glue (matches face.view(-1, seq_len, d) / cat on feature axis).
    inp_btd = jnp.concatenate(
        [face.reshape(BATCH, SEQ_LEN, DIM_FACE),
         pose.reshape(BATCH, SEQ_LEN, DIM_POSE)], axis=2)        # (B, T, dim_in)

    out, current_batch = recurrent_attention_gru(inp_btd, h0, params)
    out = jax.block_until_ready(out)

    ref = reference_forward(np.asarray(inp_btd), np.asarray(h0),
                            {k: np.asarray(v) for k, v in params.items()})
    np.testing.assert_allclose(np.asarray(out), ref, rtol=2e-2, atol=2e-2)
    assert current_batch == BATCH and out.shape == (BATCH, NUM_CLS)

    print("KERNEL_OK")
</pallas_src>

<mosaic_0001>
module attributes {stable_mosaic.version = 11 : i64} {
  func.func @rag_kernel(%arg0: memref<64x128xf32, #tpu.memory_space<vmem>>, %arg1: memref<8x128xf32, #tpu.memory_space<vmem>>, %arg2: memref<128x384xf32, #tpu.memory_space<vmem>>, %arg3: memref<1x384xf32, #tpu.memory_space<vmem>>, %arg4: memref<128x384xf32, #tpu.memory_space<vmem>>, %arg5: memref<1x384xf32, #tpu.memory_space<vmem>>, %arg6: memref<128x256xf32, #tpu.memory_space<vmem>>, %arg7: memref<1x256xf32, #tpu.memory_space<vmem>>, %arg8: memref<128x128xf32, #tpu.memory_space<vmem>>, %arg9: memref<1x128xf32, #tpu.memory_space<vmem>>, %arg10: memref<8x128xf32, #tpu.memory_space<vmem>>) attributes {dimension_semantics = [], scalar_prefetch = 0 : i64, scratch_operands = 0 : i64, tpu.core_type = #tpu.core_type<tc>} {
    %c0 = arith.constant 0 : index
    %c0_0 = arith.constant 0 : index
    %0 = vector.load %arg0[%c0, %c0_0] : memref<64x128xf32, #tpu.memory_space<vmem>>, vector<64x128xf32>
    %c0_1 = arith.constant 0 : index
    %c0_2 = arith.constant 0 : index
    %1 = vector.load %arg2[%c0_1, %c0_2] : memref<128x384xf32, #tpu.memory_space<vmem>>, vector<128x384xf32>
    %cst = arith.constant dense<0.000000e+00> : vector<64x384xf32>
    %2 = tpu.matmul %0, %1, %cst {dimension_numbers = #tpu.dot_dimension_numbers<[1], [0], [0], [1], [0, 0, 1, 1], [], []>} : vector<64x128xf32>, vector<128x384xf32>, vector<64x384xf32> -> vector<64x384xf32>
    %c0_3 = arith.constant 0 : index
    %c0_4 = arith.constant 0 : index
    %3 = vector.load %arg3[%c0_3, %c0_4] : memref<1x384xf32, #tpu.memory_space<vmem>>, vector<1x384xf32>
    %4 = vector.broadcast %3 : vector<1x384xf32> to vector<64x384xf32>
    %5 = arith.addf %2, %4 : vector<64x384xf32>
    %c0_5 = arith.constant 0 : index
    %c0_6 = arith.constant 0 : index
    %6 = vector.load %arg6[%c0_5, %c0_6] : memref<128x256xf32, #tpu.memory_space<vmem>>, vector<128x256xf32>
    %cst_7 = arith.constant dense<0.000000e+00> : vector<64x256xf32>
    %7 = tpu.matmul %0, %6, %cst_7 {dimension_numbers = #tpu.dot_dimension_numbers<[1], [0], [0], [1], [0, 0, 1, 1], [], []>} : vector<64x128xf32>, vector<128x256xf32>, vector<64x256xf32> -> vector<64x256xf32>
    %c0_8 = arith.constant 0 : index
    %c0_9 = arith.constant 0 : index
    %8 = vector.load %arg7[%c0_8, %c0_9] : memref<1x256xf32, #tpu.memory_space<vmem>>, vector<1x256xf32>
    %9 = vector.broadcast %8 : vector<1x256xf32> to vector<64x256xf32>
    %10 = arith.addf %7, %9 : vector<64x256xf32>
    %c0_10 = arith.constant 0 : index
    %c0_11 = arith.constant 0 : index
    %11 = vector.load %arg4[%c0_10, %c0_11] : memref<128x384xf32, #tpu.memory_space<vmem>>, vector<128x384xf32>
    %c0_12 = arith.constant 0 : index
    %c0_13 = arith.constant 0 : index
    %12 = vector.load %arg5[%c0_12, %c0_13] : memref<1x384xf32, #tpu.memory_space<vmem>>, vector<1x384xf32>
    %c0_14 = arith.constant 0 : index
    %c0_15 = arith.constant 0 : index
    %13 = vector.load %arg1[%c0_14, %c0_15] : memref<8x128xf32, #tpu.memory_space<vmem>>, vector<8x128xf32>
    %14 = vector.extract_strided_slice %5 {offsets = [0, 0], sizes = [8, 384], strides = [1, 1]} : vector<64x384xf32> to vector<8x384xf32>
    %cst_16 = arith.constant dense<0.000000e+00> : vector<8x384xf32>
    %15 = tpu.matmul %13, %11, %cst_16 {dimension_numbers = #tpu.dot_dimension_numbers<[1], [0], [0], [1], [0, 0, 1, 1], [], []>} : vector<8x128xf32>, vector<128x384xf32>, vector<8x384xf32> -> vector<8x384xf32>
    %16 = vector.broadcast %12 : vector<1x384xf32> to vector<8x384xf32>
    %17 = arith.addf %15, %16 : vector<8x384xf32>
    %18 = vector.extract_strided_slice %14 {offsets = [0, 0], sizes = [8, 256], strides = [1, 1]} : vector<8x384xf32> to vector<8x256xf32>
    %19 = vector.extract_strided_slice %17 {offsets = [0, 0], sizes = [8, 256], strides = [1, 1]} : vector<8x384xf32> to vector<8x256xf32>
    %20 = arith.addf %18, %19 : vector<8x256xf32>
    %21 = arith.negf %20 : vector<8x256xf32>
    %22 = math.exp %21 : vector<8x256xf32>
    %cst_17 = arith.constant 1.000000e+00 : f32
    %23 = vector.broadcast %cst_17 : f32 to vector<8x256xf32>
    %24 = arith.addf %23, %22 : vector<8x256xf32>
    %25 = arith.divf %23, %24 : vector<8x256xf32>
    %26 = vector.extract_strided_slice %25 {offsets = [0, 0], sizes = [8, 128], strides = [1, 1]} : vector<8x256xf32> to vector<8x128xf32>
    %27 = vector.extract_strided_slice %25 {offsets = [0, 128], sizes = [8, 128], strides = [1, 1]} : vector<8x256xf32> to vector<8x128xf32>
    %28 = vector.extract_strided_slice %14 {offsets = [0, 256], sizes = [8, 128], strides = [1, 1]} : vector<8x384xf32> to vector<8x128xf32>
    %29 = vector.extract_strided_slice %17 {offsets = [0, 256], sizes = [8, 128], strides = [1, 1]} : vector<8x384xf32> to vector<8x128xf32>
    %30 = arith.mulf %26, %29 : vector<8x128xf32>
    %31 = arith.addf %28, %30 : vector<8x128xf32>
    %32 = math.tanh %31 : vector<8x128xf32>
    %cst_18 = arith.constant 1.000000e+00 : f32
    %33 = vector.broadcast %cst_18 : f32 to vector<8x128xf32>
    %34 = arith.subf %33, %27 : vector<8x128xf32>
    %35 = arith.mulf %34, %32 : vector<8x128xf32>
    %36 = arith.mulf %27, %13 : vector<8x128xf32>
    %37 = arith.addf %35, %36 : vector<8x128xf32>
    %38 = vector.extract_strided_slice %5 {offsets = [8, 0], sizes = [8, 384], strides = [1, 1]} : vector<64x384xf32> to vector<8x384xf32>
    %cst_19 = arith.constant dense<0.000000e+00> : vector<8x384xf32>
    %39 = tpu.matmul %37, %11, %cst_19 {dimension_numbers = #tpu.dot_dimension_numbers<[1], [0], [0], [1], [0, 0, 1, 1], [], []>} : vector<8x128xf32>, vector<128x384xf32>, vector<8x384xf32> -> vector<8x384xf32>
    %40 = vector.broadcast %12 : vector<1x384xf32> to vector<8x384xf32>
    %41 = arith.addf %39, %40 : vector<8x384xf32>
    %42 = vector.extract_strided_slice %38 {offsets = [0, 0], sizes = [8, 256], strides = [1, 1]} : vector<8x384xf32> to vector<8x256xf32>
    %43 = vector.extract_strided_slice %41 {offsets = [0, 0], sizes = [8, 256], strides = [1, 1]} : vector<8x384xf32> to vector<8x256xf32>
    %44 = arith.addf %42, %43 : vector<8x256xf32>
    %45 = arith.negf %44 : vector<8x256xf32>
    %46 = math.exp %45 : vector<8x256xf32>
    %cst_20 = arith.constant 1.000000e+00 : f32
    %47 = vector.broadcast %cst_20 : f32 to vector<8x256xf32>
    %48 = arith.addf %47, %46 : vector<8x256xf32>
    %49 = arith.divf %47, %48 : vector<8x256xf32>
    %50 = vector.extract_strided_slice %49 {offsets = [0, 0], sizes = [8, 128], strides = [1, 1]} : vector<8x256xf32> to vector<8x128xf32>
    %51 = vector.extract_strided_slice %49 {offsets = [0, 128], sizes = [8, 128], strides = [1, 1]} : vector<8x256xf32> to vector<8x128xf32>
    %52 = vector.extract_strided_slice %38 {offsets = [0, 256], sizes = [8, 128], strides = [1, 1]} : vector<8x384xf32> to vector<8x128xf32>
    %53 = vector.extract_strided_slice %41 {offsets = [0, 256], sizes = [8, 128], strides = [1, 1]} : vector<8x384xf32> to vector<8x128xf32>
    %54 = arith.mulf %50, %53 : vector<8x128xf32>
    %55 = arith.addf %52, %54 : vector<8x128xf32>
    %56 = math.tanh %55 : vector<8x128xf32>
    %cst_21 = arith.constant 1.000000e+00 : f32
    %57 = vector.broadcast %cst_21 : f32 to vector<8x128xf32>
    %58 = arith.subf %57, %51 : vector<8x128xf32>
    %59 = arith.mulf %58, %56 : vector<8x128xf32>
    %60 = arith.mulf %51, %37 : vector<8x128xf32>
    %61 = arith.addf %59, %60 : vector<8x128xf32>
    %62 = vector.extract_strided_slice %5 {offsets = [16, 0], sizes = [8, 384], strides = [1, 1]} : vector<64x384xf32> to vector<8x384xf32>
    %cst_22 = arith.constant dense<0.000000e+00> : vector<8x384xf32>
    %63 = tpu.matmul %61, %11, %cst_22 {dimension_numbers = #tpu.dot_dimension_numbers<[1], [0], [0], [1], [0, 0, 1, 1], [], []>} : vector<8x128xf32>, vector<128x384xf32>, vector<8x384xf32> -> vector<8x384xf32>
    %64 = vector.broadcast %12 : vector<1x384xf32> to vector<8x384xf32>
    %65 = arith.addf %63, %64 : vector<8x384xf32>
    %66 = vector.extract_strided_slice %62 {offsets = [0, 0], sizes = [8, 256], strides = [1, 1]} : vector<8x384xf32> to vector<8x256xf32>
    %67 = vector.extract_strided_slice %65 {offsets = [0, 0], sizes = [8, 256], strides = [1, 1]} : vector<8x384xf32> to vector<8x256xf32>
    %68 = arith.addf %66, %67 : vector<8x256xf32>
    %69 = arith.negf %68 : vector<8x256xf32>
    %70 = math.exp %69 : vector<8x256xf32>
    %cst_23 = arith.constant 1.000000e+00 : f32
    %71 = vector.broadcast %cst_23 : f32 to vector<8x256xf32>
    %72 = arith.addf %71, %70 : vector<8x256xf32>
    %73 = arith.divf %71, %72 : vector<8x256xf32>
    %74 = vector.extract_strided_slice %73 {offsets = [0, 0], sizes = [8, 128], strides = [1, 1]} : vector<8x256xf32> to vector<8x128xf32>
    %75 = vector.extract_strided_slice %73 {offsets = [0, 128], sizes = [8, 128], strides = [1, 1]} : vector<8x256xf32> to vector<8x128xf32>
    %76 = vector.extract_strided_slice %62 {offsets = [0, 256], sizes = [8, 128], strides = [1, 1]} : vector<8x384xf32> to vector<8x128xf32>
    %77 = vector.extract_strided_slice %65 {offsets = [0, 256], sizes = [8, 128], strides = [1, 1]} : vector<8x384xf32> to vector<8x128xf32>
    %78 = arith.mulf %74, %77 : vector<8x128xf32>
    %79 = arith.addf %76, %78 : vector<8x128xf32>
    %80 = math.tanh %79 : vector<8x128xf32>
    %cst_24 = arith.constant 1.000000e+00 : f32
    %81 = vector.broadcast %cst_24 : f32 to vector<8x128xf32>
    %82 = arith.subf %81, %75 : vector<8x128xf32>
    %83 = arith.mulf %82, %80 : vector<8x128xf32>
    %84 = arith.mulf %75, %61 : vector<8x128xf32>
    %85 = arith.addf %83, %84 : vector<8x128xf32>
    %86 = vector.extract_strided_slice %5 {offsets = [24, 0], sizes = [8, 384], strides = [1, 1]} : vector<64x384xf32> to vector<8x384xf32>
    %cst_25 = arith.constant dense<0.000000e+00> : vector<8x384xf32>
    %87 = tpu.matmul %85, %11, %cst_25 {dimension_numbers = #tpu.dot_dimension_numbers<[1], [0], [0], [1], [0, 0, 1, 1], [], []>} : vector<8x128xf32>, vector<128x384xf32>, vector<8x384xf32> -> vector<8x384xf32>
    %88 = vector.broadcast %12 : vector<1x384xf32> to vector<8x384xf32>
    %89 = arith.addf %87, %88 : vector<8x384xf32>
    %90 = vector.extract_strided_slice %86 {offsets = [0, 0], sizes = [8, 256], strides = [1, 1]} : vector<8x384xf32> to vector<8x256xf32>
    %91 = vector.extract_strided_slice %89 {offsets = [0, 0], sizes = [8, 256], strides = [1, 1]} : vector<8x384xf32> to vector<8x256xf32>
    %92 = arith.addf %90, %91 : vector<8x256xf32>
    %93 = arith.negf %92 : vector<8x256xf32>
    %94 = math.exp %93 : vector<8x256xf32>
    %cst_26 = arith.constant 1.000000e+00 : f32
    %95 = vector.broadcast %cst_26 : f32 to vector<8x256xf32>
    %96 = arith.addf %95, %94 : vector<8x256xf32>
    %97 = arith.divf %95, %96 : vector<8x256xf32>
    %98 = vector.extract_strided_slice %97 {offsets = [0, 0], sizes = [8, 128], strides = [1, 1]} : vector<8x256xf32> to vector<8x128xf32>
    %99 = vector.extract_strided_slice %97 {offsets = [0, 128], sizes = [8, 128], strides = [1, 1]} : vector<8x256xf32> to vector<8x128xf32>
    %100 = vector.extract_strided_slice %86 {offsets = [0, 256], sizes = [8, 128], strides = [1, 1]} : vector<8x384xf32> to vector<8x128xf32>
    %101 = vector.extract_strided_slice %89 {offsets = [0, 256], sizes = [8, 128], strides = [1, 1]} : vector<8x384xf32> to vector<8x128xf32>
    %102 = arith.mulf %98, %101 : vector<8x128xf32>
    %103 = arith.addf %100, %102 : vector<8x128xf32>
    %104 = math.tanh %103 : vector<8x128xf32>
    %cst_27 = arith.constant 1.000000e+00 : f32
    %105 = vector.broadcast %cst_27 : f32 to vector<8x128xf32>
    %106 = arith.subf %105, %99 : vector<8x128xf32>
    %107 = arith.mulf %106, %104 : vector<8x128xf32>
    %108 = arith.mulf %99, %85 : vector<8x128xf32>
    %109 = arith.addf %107, %108 : vector<8x128xf32>
    %110 = vector.extract_strided_slice %5 {offsets = [32, 0], sizes = [8, 384], strides = [1, 1]} : vector<64x384xf32> to vector<8x384xf32>
    %cst_28 = arith.constant dense<0.000000e+00> : vector<8x384xf32>
    %111 = tpu.matmul %109, %11, %cst_28 {dimension_numbers = #tpu.dot_dimension_numbers<[1], [0], [0], [1], [0, 0, 1, 1], [], []>} : vector<8x128xf32>, vector<128x384xf32>, vector<8x384xf32> -> vector<8x384xf32>
    %112 = vector.broadcast %12 : vector<1x384xf32> to vector<8x384xf32>
    %113 = arith.addf %111, %112 : vector<8x384xf32>
    %114 = vector.extract_strided_slice %110 {offsets = [0, 0], sizes = [8, 256], strides = [1, 1]} : vector<8x384xf32> to vector<8x256xf32>
    %115 = vector.extract_strided_slice %113 {offsets = [0, 0], sizes = [8, 256], strides = [1, 1]} : vector<8x384xf32> to vector<8x256xf32>
    %116 = arith.addf %114, %115 : vector<8x256xf32>
    %117 = arith.negf %116 : vector<8x256xf32>
    %118 = math.exp %117 : vector<8x256xf32>
    %cst_29 = arith.constant 1.000000e+00 : f32
    %119 = vector.broadcast %cst_29 : f32 to vector<8x256xf32>
    %120 = arith.addf %119, %118 : vector<8x256xf32>
    %121 = arith.divf %119, %120 : vector<8x256xf32>
    %122 = vector.extract_strided_slice %121 {offsets = [0, 0], sizes = [8, 128], strides = [1, 1]} : vector<8x256xf32> to vector<8x128xf32>
    %123 = vector.extract_strided_slice %121 {offsets = [0, 128], sizes = [8, 128], strides = [1, 1]} : vector<8x256xf32> to vector<8x128xf32>
    %124 = vector.extract_strided_slice %110 {offsets = [0, 256], sizes = [8, 128], strides = [1, 1]} : vector<8x384xf32> to vector<8x128xf32>
    %125 = vector.extract_strided_slice %113 {offsets = [0, 256], sizes = [8, 128], strides = [1, 1]} : vector<8x384xf32> to vector<8x128xf32>
    %126 = arith.mulf %122, %125 : vector<8x128xf32>
    %127 = arith.addf %124, %126 : vector<8x128xf32>
    %128 = math.tanh %127 : vector<8x128xf32>
    %cst_30 = arith.constant 1.000000e+00 : f32
    %129 = vector.broadcast %cst_30 : f32 to vector<8x128xf32>
    %130 = arith.subf %129, %123 : vector<8x128xf32>
    %131 = arith.mulf %130, %128 : vector<8x128xf32>
    %132 = arith.mulf %123, %109 : vector<8x128xf32>
    %133 = arith.addf %131, %132 : vector<8x128xf32>
    %134 = vector.extract_strided_slice %5 {offsets = [40, 0], sizes = [8, 384], strides = [1, 1]} : vector<64x384xf32> to vector<8x384xf32>
    %cst_31 = arith.constant dense<0.000000e+00> : vector<8x384xf32>
    %135 = tpu.matmul %133, %11, %cst_31 {dimension_numbers = #tpu.dot_dimension_numbers<[1], [0], [0], [1], [0, 0, 1, 1], [], []>} : vector<8x128xf32>, vector<128x384xf32>, vector<8x384xf32> -> vector<8x384xf32>
    %136 = vector.broadcast %12 : vector<1x384xf32> to vector<8x384xf32>
    %137 = arith.addf %135, %136 : vector<8x384xf32>
    %138 = vector.extract_strided_slice %134 {offsets = [0, 0], sizes = [8, 256], strides = [1, 1]} : vector<8x384xf32> to vector<8x256xf32>
    %139 = vector.extract_strided_slice %137 {offsets = [0, 0], sizes = [8, 256], strides = [1, 1]} : vector<8x384xf32> to vector<8x256xf32>
    %140 = arith.addf %138, %139 : vector<8x256xf32>
    %141 = arith.negf %140 : vector<8x256xf32>
    %142 = math.exp %141 : vector<8x256xf32>
    %cst_32 = arith.constant 1.000000e+00 : f32
    %143 = vector.broadcast %cst_32 : f32 to vector<8x256xf32>
    %144 = arith.addf %143, %142 : vector<8x256xf32>
    %145 = arith.divf %143, %144 : vector<8x256xf32>
    %146 = vector.extract_strided_slice %145 {offsets = [0, 0], sizes = [8, 128], strides = [1, 1]} : vector<8x256xf32> to vector<8x128xf32>
    %147 = vector.extract_strided_slice %145 {offsets = [0, 128], sizes = [8, 128], strides = [1, 1]} : vector<8x256xf32> to vector<8x128xf32>
    %148 = vector.extract_strided_slice %134 {offsets = [0, 256], sizes = [8, 128], strides = [1, 1]} : vector<8x384xf32> to vector<8x128xf32>
    %149 = vector.extract_strided_slice %137 {offsets = [0, 256], sizes = [8, 128], strides = [1, 1]} : vector<8x384xf32> to vector<8x128xf32>
    %150 = arith.mulf %146, %149 : vector<8x128xf32>
    %151 = arith.addf %148, %150 : vector<8x128xf32>
    %152 = math.tanh %151 : vector<8x128xf32>
    %cst_33 = arith.constant 1.000000e+00 : f32
    %153 = vector.broadcast %cst_33 : f32 to vector<8x128xf32>
    %154 = arith.subf %153, %147 : vector<8x128xf32>
    %155 = arith.mulf %154, %152 : vector<8x128xf32>
    %156 = arith.mulf %147, %133 : vector<8x128xf32>
    %157 = arith.addf %155, %156 : vector<8x128xf32>
    %158 = vector.extract_strided_slice %5 {offsets = [48, 0], sizes = [8, 384], strides = [1, 1]} : vector<64x384xf32> to vector<8x384xf32>
    %cst_34 = arith.constant dense<0.000000e+00> : vector<8x384xf32>
    %159 = tpu.matmul %157, %11, %cst_34 {dimension_numbers = #tpu.dot_dimension_numbers<[1], [0], [0], [1], [0, 0, 1, 1], [], []>} : vector<8x128xf32>, vector<128x384xf32>, vector<8x384xf32> -> vector<8x384xf32>
    %160 = vector.broadcast %12 : vector<1x384xf32> to vector<8x384xf32>
    %161 = arith.addf %159, %160 : vector<8x384xf32>
    %162 = vector.extract_strided_slice %158 {offsets = [0, 0], sizes = [8, 256], strides = [1, 1]} : vector<8x384xf32> to vector<8x256xf32>
    %163 = vector.extract_strided_slice %161 {offsets = [0, 0], sizes = [8, 256], strides = [1, 1]} : vector<8x384xf32> to vector<8x256xf32>
    %164 = arith.addf %162, %163 : vector<8x256xf32>
    %165 = arith.negf %164 : vector<8x256xf32>
    %166 = math.exp %165 : vector<8x256xf32>
    %cst_35 = arith.constant 1.000000e+00 : f32
    %167 = vector.broadcast %cst_35 : f32 to vector<8x256xf32>
    %168 = arith.addf %167, %166 : vector<8x256xf32>
    %169 = arith.divf %167, %168 : vector<8x256xf32>
    %170 = vector.extract_strided_slice %169 {offsets = [0, 0], sizes = [8, 128], strides = [1, 1]} : vector<8x256xf32> to vector<8x128xf32>
    %171 = vector.extract_strided_slice %169 {offsets = [0, 128], sizes = [8, 128], strides = [1, 1]} : vector<8x256xf32> to vector<8x128xf32>
    %172 = vector.extract_strided_slice %158 {offsets = [0, 256], sizes = [8, 128], strides = [1, 1]} : vector<8x384xf32> to vector<8x128xf32>
    %173 = vector.extract_strided_slice %161 {offsets = [0, 256], sizes = [8, 128], strides = [1, 1]} : vector<8x384xf32> to vector<8x128xf32>
    %174 = arith.mulf %170, %173 : vector<8x128xf32>
    %175 = arith.addf %172, %174 : vector<8x128xf32>
    %176 = math.tanh %175 : vector<8x128xf32>
    %cst_36 = arith.constant 1.000000e+00 : f32
    %177 = vector.broadcast %cst_36 : f32 to vector<8x128xf32>
    %178 = arith.subf %177, %171 : vector<8x128xf32>
    %179 = arith.mulf %178, %176 : vector<8x128xf32>
    %180 = arith.mulf %171, %157 : vector<8x128xf32>
    %181 = arith.addf %179, %180 : vector<8x128xf32>
    %182 = vector.extract_strided_slice %5 {offsets = [56, 0], sizes = [8, 384], strides = [1, 1]} : vector<64x384xf32> to vector<8x384xf32>
    %cst_37 = arith.constant dense<0.000000e+00> : vector<8x384xf32>
    %183 = tpu.matmul %181, %11, %cst_37 {dimension_numbers = #tpu.dot_dimension_numbers<[1], [0], [0], [1], [0, 0, 1, 1], [], []>} : vector<8x128xf32>, vector<128x384xf32>, vector<8x384xf32> -> vector<8x384xf32>
    %184 = vector.broadcast %12 : vector<1x384xf32> to vector<8x384xf32>
    %185 = arith.addf %183, %184 : vector<8x384xf32>
    %186 = vector.extract_strided_slice %182 {offsets = [0, 0], sizes = [8, 256], strides = [1, 1]} : vector<8x384xf32> to vector<8x256xf32>
    %187 = vector.extract_strided_slice %185 {offsets = [0, 0], sizes = [8, 256], strides = [1, 1]} : vector<8x384xf32> to vector<8x256xf32>
    %188 = arith.addf %186, %187 : vector<8x256xf32>
    %189 = arith.negf %188 : vector<8x256xf32>
    %190 = math.exp %189 : vector<8x256xf32>
    %cst_38 = arith.constant 1.000000e+00 : f32
    %191 = vector.broadcast %cst_38 : f32 to vector<8x256xf32>
    %192 = arith.addf %191, %190 : vector<8x256xf32>
    %193 = arith.divf %191, %192 : vector<8x256xf32>
    %194 = vector.extract_strided_slice %193 {offsets = [0, 0], sizes = [8, 128], strides = [1, 1]} : vector<8x256xf32> to vector<8x128xf32>
    %195 = vector.extract_strided_slice %193 {offsets = [0, 128], sizes = [8, 128], strides = [1, 1]} : vector<8x256xf32> to vector<8x128xf32>
    %196 = vector.extract_strided_slice %182 {offsets = [0, 256], sizes = [8, 128], strides = [1, 1]} : vector<8x384xf32> to vector<8x128xf32>
    %197 = vector.extract_strided_slice %185 {offsets = [0, 256], sizes = [8, 128], strides = [1, 1]} : vector<8x384xf32> to vector<8x128xf32>
    %198 = arith.mulf %194, %197 : vector<8x128xf32>
    %199 = arith.addf %196, %198 : vector<8x128xf32>
    %200 = math.tanh %199 : vector<8x128xf32>
    %cst_39 = arith.constant 1.000000e+00 : f32
    %201 = vector.broadcast %cst_39 : f32 to vector<8x128xf32>
    %202 = arith.subf %201, %195 : vector<8x128xf32>
    %203 = arith.mulf %202, %200 : vector<8x128xf32>
    %204 = arith.mulf %195, %181 : vector<8x128xf32>
    %205 = arith.addf %203, %204 : vector<8x128xf32>
    %206 = vector.extract_strided_slice %10 {offsets = [0, 0], sizes = [64, 128], strides = [1, 1]} : vector<64x256xf32> to vector<64x128xf32>
    %207 = vector.extract_strided_slice %10 {offsets = [0, 128], sizes = [64, 128], strides = [1, 1]} : vector<64x256xf32> to vector<64x128xf32>
    %cst_40 = arith.constant dense<0.000000e+00> : vector<8x64xf32>
    %208 = tpu.matmul %205, %206, %cst_40 {dimension_numbers = #tpu.dot_dimension_numbers<[1], [1], [0], [0], [0, 0, 1, 0], [], []>} : vector<8x128xf32>, vector<64x128xf32>, vector<8x64xf32> -> vector<8x64xf32>
    %cst_41 = arith.constant 0.204124153 : f32
    %209 = vector.broadcast %cst_41 : f32 to vector<8x64xf32>
    %210 = arith.mulf %208, %209 : vector<8x64xf32>
    %211 = tpu.iota {dimensions = array<i32: 1>} : vector<8x64xi32>
    %212 = tpu.iota {dimensions = array<i32: 0>} : vector<8x64xi32>
    %c7_i32 = arith.constant 7 : i32
    %213 = vector.broadcast %c7_i32 : i32 to vector<8x64xi32>
    %214 = arith.andi %211, %213 : vector<8x64xi32>
    %215 = arith.cmpi eq, %214, %212 : vector<8x64xi32>
    %cst_42 = arith.constant -1.000000e+30 : f32
    %216 = vector.broadcast %cst_42 : f32 to vector<8x64xf32>
    %217 = arith.select %215, %210, %216 : vector<8x64xi1>, vector<8x64xf32>
    %cst_43 = arith.constant dense<0xFF800000> : vector<8xf32>
    %218 = vector.multi_reduction <maximumf>, %217, %cst_43 [1] : vector<8x64xf32> to vector<8xf32>
    %219 = vector.shape_cast %218 : vector<8xf32> to vector<8x1xf32>
    %220 = vector.broadcast %219 : vector<8x1xf32> to vector<8x64xf32>
    %221 = arith.subf %217, %220 : vector<8x64xf32>
    %222 = math.exp %221 : vector<8x64xf32>
    %cst_44 = arith.constant dense<0.000000e+00> : vector<8xf32>
    %223 = vector.multi_reduction <add>, %222, %cst_44 [1] : vector<8x64xf32> to vector<8xf32>
    %224 = vector.shape_cast %223 : vector<8xf32> to vector<8x1xf32>
    %225 = tpu.reciprocal %224 {approx = true} : vector<8x1xf32> -> vector<8x1xf32>
    %226 = vector.broadcast %225 : vector<8x1xf32> to vector<8x64xf32>
    %227 = arith.mulf %222, %226 : vector<8x64xf32>
    %cst_45 = arith.constant dense<0.000000e+00> : vector<8x128xf32>
    %228 = tpu.matmul %227, %207, %cst_45 {dimension_numbers = #tpu.dot_dimension_numbers<[1], [0], [0], [1], [0, 0, 1, 1], [], []>} : vector<8x64xf32>, vector<64x128xf32>, vector<8x128xf32> -> vector<8x128xf32>
    %cst_46 = arith.constant 0.000000e+00 : f32
    %229 = vector.broadcast %cst_46 : f32 to vector<8x128xf32>
    %230 = arith.maximumf %228, %229 : vector<8x128xf32>
    %c0_47 = arith.constant 0 : index
    %c0_48 = arith.constant 0 : index
    %231 = vector.load %arg8[%c0_47, %c0_48] : memref<128x128xf32, #tpu.memory_space<vmem>>, vector<128x128xf32>
    %cst_49 = arith.constant dense<0.000000e+00> : vector<8x128xf32>
    %232 = tpu.matmul %230, %231, %cst_49 {dimension_numbers = #tpu.dot_dimension_numbers<[1], [0], [0], [1], [0, 0, 1, 1], [], []>} : vector<8x128xf32>, vector<128x128xf32>, vector<8x128xf32> -> vector<8x128xf32>
    %c0_50 = arith.constant 0 : index
    %c0_51 = arith.constant 0 : index
    %233 = vector.load %arg9[%c0_50, %c0_51] : memref<1x128xf32, #tpu.memory_space<vmem>>, vector<1x128xf32>
    %234 = vector.broadcast %233 : vector<1x128xf32> to vector<8x128xf32>
    %235 = arith.addf %232, %234 : vector<8x128xf32>
    %cst_52 = arith.constant dense<0xFF800000> : vector<8xf32>
    %236 = vector.multi_reduction <maximumf>, %235, %cst_52 [1] : vector<8x128xf32> to vector<8xf32>
    %237 = vector.shape_cast %236 : vector<8xf32> to vector<8x1xf32>
    %238 = vector.broadcast %237 : vector<8x1xf32> to vector<8x128xf32>
    %239 = arith.subf %235, %238 : vector<8x128xf32>
    %240 = math.exp %239 : vector<8x128xf32>
    %cst_53 = arith.constant dense<0.000000e+00> : vector<8xf32>
    %241 = vector.multi_reduction <add>, %240, %cst_53 [1] : vector<8x128xf32> to vector<8xf32>
    %242 = vector.shape_cast %241 : vector<8xf32> to vector<8x1xf32>
    %243 = math.log %242 : vector<8x1xf32>
    %244 = arith.addf %243, %237 : vector<8x1xf32>
    %245 = vector.broadcast %244 : vector<8x1xf32> to vector<8x128xf32>
    %246 = arith.subf %235, %245 : vector<8x128xf32>
    %c0_54 = arith.constant 0 : index
    %c0_55 = arith.constant 0 : index
    %247 = vector.load %arg10[%c0_54, %c0_55] : memref<8x128xf32, #tpu.memory_space<vmem>>, vector<8x128xf32>
    tpu.vector_store %arg10[%c0_54, %c0_55], %246 {strides = array<i32>} : memref<8x128xf32, #tpu.memory_space<vmem>>, vector<8x128xf32>,
    return
  }
}

</mosaic_0001>

<bundles_post_ra>
// kernel: tpu_custom_call.1
= control target key start
LH: loop header
LB: loop body
LE: loop exit
PB: predicated region body
PF: predicated region fallthrough
CT: control target
= control target key end

     0   :  { %15 = vsyncpa [#allocation3], 0  ;;  %s2801_s0 = inlined_call_operand.hbm [shape: f32[64,128], index: 0, kind: input, shape index: {}]   ;;  %s2802_s1 = inlined_call_operand.hbm [shape: f32[8,128], index: 1, kind: input, shape index: {}]   ;;  %s2803_s2 = inlined_call_operand.hbm [shape: f32[128,384], index: 2, kind: input, shape index: {}]   ;;  %s2804_s3 = inlined_call_operand.hbm [shape: f32[1,384], index: 3, kind: input, shape index: {}]   ;;  %s2805_s4 = inlined_call_operand.hbm [shape: f32[128,384], index: 4, kind: input, shape index: {}]   ;;  %s2806_s5 = inlined_call_operand.vmem [shape: f32[1,384], index: 5, kind: input, shape index: {}]   ;;  %s2807_s6 = inlined_call_operand.hbm [shape: f32[128,256], index: 6, kind: input, shape index: {}]   ;;  %s2808_s7 = inlined_call_operand.vmem [shape: f32[1,256], index: 7, kind: input, shape index: {}]   ;;  %s2809_s8 = inlined_call_operand.hbm [shape: f32[128,128], index: 8, kind: input, shape index: {}]   ;;  %s2810_s9 = inlined_call_operand.vmem [shape: f32[1,128], index: 9, kind: input, shape index: {}]   ;;  %s2811_s10 = inlined_call_operand.hbm [shape: f32[8,128], index: 10, kind: output, shape index: {}]  }
   0x1   :  { %16 = vsyncpa [#allocation6], 0 }
   0x2   :  { %17 = vsyncpa [#allocation9], 0 }
   0x3   :  { %18 = vsyncpa [#allocation12], 0  ;;  %s38_s15 = sshll.u32 %s2802_s1, 4  ;;  %s39_s15 = int_to_ptr.hbm [resolvable:$true] %s38_s15 }
   0x4   :  { %19 = vsyncpa [#allocation4], 0  ;;  %s1867_s16 = smov [#allocation5]   ;;  %s62_s20 = sshll.u32 %s2804_s3, 4  ;;  %s63_s20 = int_to_ptr.hbm [resolvable:$true] %s62_s20 }
   0x5   :  { %s40_s17 = sshll.u32 %s1867_s16, 4  ;;  %s1868_s21 = smov [#allocation8]   ;;  %s41_s17 = int_to_ptr.vmem [resolvable:$true] %s40_s17 }
   0x6   :  { %43 = dma.hbm_to_vmem [thread:$0]  %s39_s15, 128, %s41_s17, [#allocation6]  }
   0x7   :  { %s64_s22 = sshll.u32 %s1868_s21, 4  ;;  %s87_s25 = sshll.u32 %s2807_s6, 4  ;;  %s65_s22 = int_to_ptr.vmem [resolvable:$true] %s64_s22  ;;  %s88_s25 = int_to_ptr.hbm [resolvable:$true] %s87_s25 }
   0x8   :  { %67 = dma.hbm_to_vmem [thread:$0]  %s63_s20, 48, %s65_s22, [#allocation9]  }
   0x9   :  { %s1869_s1 = smov [#allocation11]   ;;  %s24_s29 = sshll.u32 %s2801_s0, 4  ;;  %s25_s29 = int_to_ptr.hbm [resolvable:$true] %s24_s29 }
   0xa   :  { %s89_s26 = sshll.u32 %s1869_s1, 4  ;;  %s1870_s30 = smov 256   ;;  %s90_s26 = int_to_ptr.vmem [resolvable:$true] %s89_s26 }
   0xb   :  { %s1871_s3 = smov 16   ;;  %s1872_s11 = smov [#allocation2]  }
   0xc   :  { %95 = dma.hbm_to_vmem [thread:$0]  %s88_s25, 4096, %s90_s26, [#allocation12], %s1870_s30, %s1870_s30, %s1871_s3  }
   0xd   :  { %s26_s12 = sshll.u32 %s1872_s11, 4  ;;  %s1873_s13 = smov 128   ;;  %s27_s12 = int_to_ptr.vmem [resolvable:$true] %s26_s12 }
   0xe   :  { %s1874_s14 = smov 8   ;;  %s48_s16 = sshll.u32 %s2803_s2, 4  ;;  %s49_s16 = int_to_ptr.hbm [resolvable:$true] %s48_s16 }
   0xf   :  { %32 = dma.hbm_to_vmem [thread:$0]  %s25_s29, 1024, %s27_s12, [#allocation3], %s1873_s13, %s1873_s13, %s1874_s14  }
  0x10   :  { %s1875_s17 = smov [#allocation7]   ;;  %s72_s20 = sshll.u32 %s2805_s4, 4  ;;  %s73_s20 = int_to_ptr.hbm [resolvable:$true] %s72_s20 }
  0x11   :  { %s50_s18 = sshll.u32 %s1875_s17, 4  ;;  %s1876_s21 = smov 384   ;;  %s51_s18 = int_to_ptr.vmem [resolvable:$true] %s50_s18 }
  0x12   :  { %s1877_s22 = smov 24   ;;  %s1878_s23 = smov [#allocation10]  }
  0x13   :  { %56 = dma.hbm_to_vmem [thread:$0]  %s49_s16, 6144, %s51_s18, [#allocation6], %s1876_s21, %s1876_s21, %s1877_s22  }
  0x14   :  { %s74_s24 = sshll.u32 %s1878_s23, 4  ;;  %s102_s26 = sshll.u32 %s2809_s8, 4  ;;  %s75_s24 = int_to_ptr.vmem [resolvable:$true] %s74_s24  ;;  %s103_s26 = int_to_ptr.hbm [resolvable:$true] %s102_s26 }
  0x15   :  { %80 = dma.hbm_to_vmem [thread:$0]  %s73_s20, 6144, %s75_s24, [#allocation9], %s1876_s21, %s1876_s21, %s1877_s22  }
  0x16   :  { %s1879_s2 = smov [#allocation13]  }
  0x17   :  { %s104_s27 = sshll.u32 %s1879_s2, 4  ;;  %s105_s27 = int_to_ptr.vmem [resolvable:$true] %s104_s27 }
  0x18   :  { %110 = dma.hbm_to_vmem [thread:$0]  %s103_s26, 2048, %s105_s27, [#allocation12], %s1873_s13, %s1873_s13, %s1874_s14  }
  0x19   :  { %1857 = dma.done.wait [#allocation3], 1024  }
  0x1a   :  { %1858 = vsyncadd [#allocation3], 4294966272 }
  0x1b   :  { %1859 = dma.done.wait [#allocation6], 6272  }
  0x1c   :  { %1860 = vsyncadd [#allocation6], 4294961024 }
  0x1d   :  { %1861 = dma.done.wait [#allocation9], 6192  }
  0x1e   :  { %1862 = vsyncadd [#allocation9], 4294961104 }
  0x1f   :  { %1863 = dma.done.wait [#allocation12], 6144  }
  0x20   :  { %1864 = vsyncadd [#allocation12], 4294961152  ;;  %v195_v0 = vld [vmem:[#allocation7 + $0x170] sm:$0xff]  ;;  %v196_v1 = vld [vmem:[#allocation7 + $0x178] sm:$0xff]  ;;  %s1880_s30 = smov [#allocation14]   ;;  %s1484_s13 = sshll.u32 %s2811_s10, 4  ;;  %s1485_s13 = int_to_ptr.hbm [resolvable:$true] %s1484_s13 }
  0x21   :  { %v192_v2 = vld [vmem:[#allocation7 + $0x158] sm:$0xff]  ;;  %246 = vmatpush.msra.mxu1 %v195_v0  ;;  %287 = vmatpush.msra.mxu2 %v196_v1  ;;  %v193_v3 = vld [vmem:[#allocation7 + $0x160] sm:$0xff]  ;;  %v190_v5 = vld [vmem:[#allocation7 + $0x148] sm:$0xff]  ;;  %s1482_s3 = sshll.u32 %s1880_s30, 4  ;;  %s1483_s3 = int_to_ptr.vmem [resolvable:$true] %s1482_s3 }
  0x22   :  { %v189_v4 = vld [vmem:[#allocation7 + $0x140] sm:$0xff]  ;;  %v186_v6 = vld [vmem:[#allocation7 + $0x128] sm:$0xff]  ;;  %v187_v7 = vld [vmem:[#allocation7 + $0x130] sm:$0xff] }
  0x23   :  { %247 = vmatpush.msra.mxu1 %v192_v2  ;;  %288 = vmatpush.msra.mxu2 %v193_v3  ;;  %v183_v8 = vld [vmem:[#allocation7 + $0x110] sm:$0xff]  ;;  %v184_v9 = vld [vmem:[#allocation7 + $0x118] sm:$0xff]  ;;  %v181_v11 = vld [vmem:[#allocation7 + $0x100] sm:$0xff] }
  0x24   :  { %v180_v10 = vld [vmem:[#allocation7 + $0xf8] sm:$0xff]  ;;  %v356_v13 = vld [vmem:[#allocation11 + $0xe0] sm:$0xff]  ;;  %v175_v18 = vld [vmem:[#allocation7 + $0xd0] sm:$0xff] }
  0x25   :  { %248 = vmatpush.msra.mxu1 %v189_v4  ;;  %289 = vmatpush.msra.mxu2 %v190_v5  ;;  %v358_v12 = vld [vmem:[#allocation11 + $0xf0] sm:$0xff]  ;;  %v177_v14 = vld [vmem:[#allocation7 + $0xe0] sm:$0xff]  ;;  %v178_v15 = vld [vmem:[#allocation7 + $0xe8] sm:$0xff] }
  0x26   :  { %366 = vmatpush.msra.mxu3 %v358_v12  ;;  %v354_v16 = vld [vmem:[#allocation11 + $0xd0] sm:$0xff]  ;;  %v174_v17 = vld [vmem:[#allocation7 + $0xc8] sm:$0xff]  ;;  %v169_v24 = vld [vmem:[#allocation7 + $0xa0] sm:$0xff] }
  0x27   :  { %249 = vmatpush.msra.mxu1 %v186_v6  ;;  %290 = vmatpush.msra.mxu2 %v187_v7  ;;  %v352_v19 = vld [vmem:[#allocation11 + $0xc0] sm:$0xff]  ;;  %v171_v20 = vld [vmem:[#allocation7 + $0xb0] sm:$0xff]  ;;  %v172_v21 = vld [vmem:[#allocation7 + $0xb8] sm:$0xff] }
  0x28   :  { %367 = vmatpush.msra.mxu3 %v356_v13  ;;  %v350_v22 = vld [vmem:[#allocation11 + $0xb0] sm:$0xff]  ;;  %v348_v25 = vld [vmem:[#allocation11 + $0xa0] sm:$0xff]  ;;  %v1959_v44 = vld [vmem:[#allocation10 + $0x168] sm:$0xff] }
  0x29   :  { %250 = vmatpush.msra.mxu1 %v183_v8  ;;  %291 = vmatpush.msra.mxu2 %v184_v9  ;;  %v168_v23 = vld [vmem:[#allocation7 + $0x98] sm:$0xff]  ;;  %v165_v26 = vld [vmem:[#allocation7 + $0x80] sm:$0xff]  ;;  %v166_v27 = vld [vmem:[#allocation7 + $0x88] sm:$0xff] }
  0x2a   :  { %368 = vmatpush.msra.mxu3 %v354_v16  ;;  %v346_v28 = vld [vmem:[#allocation11 + $0x90] sm:$0xff]  ;;  %v162_v29 = vld [vmem:[#allocation7 + $0x68] sm:$0xff]  ;;  %v157_v36 = vld [vmem:[#allocation7 + $0x40] sm:$0xff] }
  0x2b   :  { %251 = vmatpush.msra.mxu1 %v180_v10  ;;  %292 = vmatpush.msra.mxu2 %v181_v11  ;;  %v163_v30 = vld [vmem:[#allocation7 + $0x70] sm:$0xff]  ;;  %v344_v31 = vld [vmem:[#allocation11 + $0x80] sm:$0xff]  ;;  %v160_v33 = vld [vmem:[#allocation7 + $0x58] sm:$0xff] }
  0x2c   :  { %369 = vmatpush.msra.mxu3 %v352_v19  ;;  %v159_v32 = vld [vmem:[#allocation7 + $0x50] sm:$0xff]  ;;  %v156_v35 = vld [vmem:[#allocation7 + $0x38] sm:$0xff]  ;;  %v340_v37 = vld [vmem:[#allocation11 + $0x60] sm:$0xff] }
  0x2d   :  { %252 = vmatpush.msra.mxu1 %v177_v14  ;;  %293 = vmatpush.msra.mxu2 %v178_v15  ;;  %v342_v34 = vld [vmem:[#allocation11 + $0x70] sm:$0xff]  ;;  %v153_v38 = vld [vmem:[#allocation7 + $0x20] sm:$0xff]  ;;  %v154_v39 = vld [vmem:[#allocation7 + $0x28] sm:$0xff] }
  0x2e   :  { %370 = vmatpush.msra.mxu3 %v350_v22  ;;  %v338_v40 = vld [vmem:[#allocation11 + $0x50] sm:$0xff]  ;;  %v150_v41 = vld [vmem:[#allocation7 + $0x8] sm:$0xff]  ;;  %v1967_v48 = vld [vmem:[#allocation10 + $0x158] sm:$0xff] }
  0x2f   :  { %253 = vmatpush.msra.mxu1 %v174_v17  ;;  %294 = vmatpush.msra.mxu2 %v175_v18  ;;  %v151_v42 = vld [vmem:[#allocation7 + $0x10] sm:$0xff]  ;;  %v1957_v43 = vld [vmem:[#allocation2] sm:$0xff]  ;;  %v336_v46 = vld [vmem:[#allocation11 + $0x40] sm:$0xff] }
  0x30   :  { %371 = vmatpush.msra.mxu3 %v348_v25  ;;  %v1961_v45 = vld [vmem:[#allocation10 + $0x170] sm:$0xff]  ;;  %v194_v49 = vld [vmem:[#allocation7 + $0x168] sm:$0xff]  ;;  %v1971_v52 = vld [vmem:[#allocation10 + $0x138] sm:$0xff] }
  0x31   :  { %254 = vmatpush.msra.mxu1 %v171_v20  ;;  %295 = vmatpush.msra.mxu2 %v172_v21  ;;  %v1965_v47 = vld [vmem:[#allocation10 + $0x150] sm:$0xff]  ;;  %v1973_v53 = vld [vmem:[#allocation10 + $0x140] sm:$0xff]  ;;  %v1979_v57 = vld [vmem:[#allocation10 + $0x128] sm:$0xff] }
  0x32   :  { %372 = vmatpush.msra.mxu3 %v346_v28  ;;  %v334_v50 = vld [vmem:[#allocation11 + $0x30] sm:$0xff]  ;;  %205 = vmatpush.msra.mxu0 %v194_v49  ;;  %v332_v54 = vld [vmem:[#allocation11 + $0x20] sm:$0xff]  ;;  %v1985_v59 = vld [vmem:[#allocation10 + $0x108] sm:$0xff] }
  0x33   :  { %255 = vmatpush.msra.mxu1 %v168_v23  ;;  %296 = vmatpush.msra.mxu2 %v169_v24  ;;  %v191_v51 = vld [vmem:[#allocation7 + $0x150] sm:$0xff]  ;;  %v188_v55 = vld [vmem:[#allocation7 + $0x138] sm:$0xff]  ;;  %v1977_v56 = vld [vmem:[#allocation10 + $0x120] sm:$0xff] }
  0x34   :  { %373 = vmatpush.msra.mxu3 %v344_v31  ;;  %206 = vmatpush.msra.mxu0 %v191_v51  ;;  %v1981_v58 = vld [vmem:[#allocation2 + $0x8] sm:$0xff]  ;;  %v1987_v60 = vld [vmem:[#allocation10 + $0x110] sm:$0xff]  ;;  %v182_v2 = vld [vmem:[#allocation7 + $0x108] sm:$0xff] }
  0x35   :  { %256 = vmatpush.msra.mxu1 %v165_v26  ;;  %297 = vmatpush.msra.mxu2 %v166_v27  ;;  %v330_v61 = vld [vmem:[#allocation11 + $0x10] sm:$0xff]  ;;  %v185_v62 = vld [vmem:[#allocation7 + $0x120] sm:$0xff]  ;;  %v2009_v8 = vld [vmem:[#allocation2 + $0x10] sm:$0xff] }
  0x36   :  { %374 = vmatpush.msra.mxu3 %v342_v34  ;;  %207 = vmatpush.msra.mxu0 %v188_v55  ;;  %v1993_v63 = vld [vmem:[#allocation10 + $0xf0] sm:$0xff]  ;;  %v1995_v0 = vld [vmem:[#allocation10 + $0xf8] sm:$0xff]  ;;  %v328_v1 = vld [vmem:[#allocation11] sm:$0xff] }
  0x37   :  { %257 = vmatpush.msra.mxu1 %v162_v29  ;;  %298 = vmatpush.msra.mxu2 %v163_v30  ;;  %v1999_v3 = vld [vmem:[#allocation10 + $0xd8] sm:$0xff]  ;;  %v2005_v5 = vld [vmem:[#allocation10 + $0xe0] sm:$0xff]  ;;  %v179_v7 = vld [vmem:[#allocation7 + $0xf0] sm:$0xff] }
  0x38   :  { %375 = vmatpush.msra.mxu3 %v340_v37  ;;  %208 = vmatpush.msra.mxu0 %v185_v62  ;;  %v2003_v4 = vld [vmem:[#allocation10 + $0x178] sm:$0xff]  ;;  %v2007_v6 = vld [vmem:[#allocation10 + $0xc0] sm:$0xff]  ;;  %v2017_v10 = vld [vmem:[#allocation10 + $0xc8] sm:$0xff] }
  0x39   :  { %258 = vmatpush.msra.mxu1 %v159_v32  ;;  %299 = vmatpush.msra.mxu2 %v160_v33  ;;  %v2015_v9 = vld [vmem:[#allocation10 + $0x160] sm:$0xff]  ;;  %v2020_v11 = vld [vmem:[#allocation10 + $0xa8] sm:$0xff]  ;;  %v176_v12 = vld [vmem:[#allocation7 + $0xd8] sm:$0xff] }
  0x3a   :  { %376 = vmatpush.msra.mxu3 %v338_v40  ;;  %209 = vmatpush.msra.mxu0 %v182_v2  ;;  %v2024_v13 = vld [vmem:[#allocation10 + $0x148] sm:$0xff]  ;;  %v2026_v14 = vld [vmem:[#allocation10 + $0xb0] sm:$0xff]  ;;  %v173_v16 = vld [vmem:[#allocation7 + $0xc0] sm:$0xff] }
  0x3b   :  { %259 = vmatpush.msra.mxu1 %v156_v35  ;;  %300 = vmatpush.msra.mxu2 %v157_v36  ;;  %v2030_v15 = vld [vmem:[#allocation10 + $0x90] sm:$0xff]  ;;  %v2033_v17 = vld [vmem:[#allocation10 + $0x98] sm:$0xff]  ;;  %v2042_v20 = vld [vmem:[#allocation10 + $0x80] sm:$0xff] }
  0x3c   :  { %377 = vmatpush.msra.mxu3 %v336_v46  ;;  %210 = vmatpush.msra.mxu0 %v179_v7  ;;  %v2037_v18 = vld [vmem:[#allocation10 + $0x130] sm:$0xff]  ;;  %v2039_v19 = vld [vmem:[#allocation10 + $0x78] sm:$0xff]  ;;  %2865 = vst [vmem:[#allocation20_spill] sm:$0xff] %v2042_v20  ;;  %v170_v21 = vld [vmem:[#allocation7 + $0xa8] sm:$0xff] }
  0x3d   :  { %260 = vmatpush.msra.mxu1 %v153_v38  ;;  %301 = vmatpush.msra.mxu2 %v154_v39  ;;  %v2044_v22 = vld [vmem:[#allocation2 + $0x18] sm:$0xff]  ;;  %v2050_v23 = vld [vmem:[#allocation10 + $0x118] sm:$0xff]  ;;  %v2052_v24 = vld [vmem:[#allocation10 + $0x60] sm:$0xff] }
  0x3e   :  { %378 = vmatpush.msra.mxu3 %v334_v50  ;;  %211 = vmatpush.msra.mxu0 %v176_v12  ;;  %v2055_v25 = vld [vmem:[#allocation10 + $0x68] sm:$0xff]  ;;  %v2059_v27 = vld [vmem:[#allocation10 + $0x100] sm:$0xff]  ;;  %v2065_v29 = vld [vmem:[#allocation10 + $0x50] sm:$0xff] }
  0x3f   :  { %261 = vmatpush.msra.mxu1 %v150_v41  ;;  %302 = vmatpush.msra.mxu2 %v151_v42  ;;  %2866 = vst [vmem:[#allocation21_spill] sm:$0xff] %v2055_v25  ;;  %v167_v26 = vld [vmem:[#allocation7 + $0x90] sm:$0xff]  ;;  %v164_v30 = vld [vmem:[#allocation7 + $0x78] sm:$0xff]  ;;  %v161_v33 = vld [vmem:[#allocation7 + $0x60] sm:$0xff] }
  0x40   :  { %262 = vmatmul.f32.vlgmr.msra.gmra.mxu1 %v1957_v43  ;;  %303 = vmatmul.f32.vlgmr.msra.gmra.mxu2 %v1957_v43  ;;  %v2061_v28 = vld [vmem:[#allocation10 + $0x48] sm:$0xff]  ;;  %2868 = vst [vmem:[#allocation23_spill] sm:$0xff] %v2065_v29  ;;  %v2068_v31 = vld [vmem:[#allocation10 + $0x30] sm:$0xff]  ;;  %v2075_v34 = vld [vmem:[#allocation10 + $0x38] sm:$0xff] }
  0x41   :  { %505 = vmatpush.msrb.mxu1 %v1959_v44  ;;  %525 = vmatpush.msrb.mxu2 %v1961_v45  ;;  %2867 = vst [vmem:[#allocation22_spill] sm:$0xff] %v2061_v28  ;;  %v2072_v32 = vld [vmem:[#allocation10 + $0xe8] sm:$0xff]  ;;  %v2077_v35 = vld [vmem:[#allocation10 + $0x18] sm:$0xff]  ;;  %v2084_v37 = vld [vmem:[#allocation10 + $0xd0] sm:$0xff] }
  0x42   :  { %379 = vmatpush.msra.mxu3 %v332_v54  ;;  %212 = vmatpush.msra.mxu0 %v173_v16  ;;  %2869 = vst [vmem:[#allocation24_spill] sm:$0xff] %v2068_v31  ;;  %v2079_v36 = vld [vmem:[#allocation2 + $0x20] sm:$0xff]  ;;  %v158_v38 = vld [vmem:[#allocation7 + $0x48] sm:$0xff]  ;;  %v155_v42 = vld [vmem:[#allocation7 + $0x30] sm:$0xff] }
  0x43   :  { %506 = vmatpush.msrb.mxu1 %v1965_v47  ;;  %526 = vmatpush.msrb.mxu2 %v1967_v48  ;;  %2870 = vst [vmem:[#allocation25_spill] sm:$0xff] %v2075_v34  ;;  %v2088_v39 = vld [vmem:[#allocation10 + $0x20] sm:$0xff]  ;;  %v2094_v41 = vld [vmem:[#allocation10 + $0xb8] sm:$0xff]  ;;  %v2097_v46 = vld [vmem:[#allocation10 + $0x8] sm:$0xff] }
  0x44   :  { %380 = vmatpush.msra.mxu3 %v330_v61  ;;  %213 = vmatpush.msra.mxu0 %v170_v21  ;;  %2871 = vst [vmem:[#allocation26_spill] sm:$0xff] %v2077_v35  ;;  %v2090_v40 = vld [vmem:[#allocation10] sm:$0xff]  ;;  %v152_v49 = vld [vmem:[#allocation7 + $0x18] sm:$0xff]  ;;  %v2110_v55 = vld [vmem:[#allocation10 + $0x88] sm:$0xff] }
  0x45   :  { %507 = vmatpush.msrb.mxu1 %v1971_v52  ;;  %527 = vmatpush.msrb.mxu2 %v1973_v53  ;;  %2872 = vst [vmem:[#allocation27_spill] sm:$0xff] %v2079_v36  ;;  %v2102_v50 = vld [vmem:[#allocation10 + $0xa0] sm:$0xff]  ;;  %v2116_v61 = vld [vmem:[#allocation10 + $0x70] sm:$0xff]  ;;  %v2123_v62 = vld [vmem:[#allocation10 + $0x58] sm:$0xff] }
  0x46   :  { %381 = vmatpush.msra.mxu3 %v328_v1  ;;  %214 = vmatpush.msra.mxu0 %v167_v26  ;;  %2873 = vst [vmem:[#allocation28_spill] sm:$0xff] %v2088_v39  ;;  %v149_v51 = vld [vmem:[#allocation7] sm:$0xff]  ;;  %v2127_v1 = vld [vmem:[#allocation2 + $0x30] sm:$0xff]  ;;  %v2144_v12 = vld [vmem:[#allocation10 + $0x10] sm:$0xff] }
  0x47   :  { %508 = vmatpush.msrb.mxu1 %v1977_v56  ;;  %528 = vmatpush.msrb.mxu2 %v1979_v57  ;;  %2874 = vst [vmem:[#allocation29_spill] sm:$0xff] %v2090_v40  ;;  %v2106_v54 = vld [vmem:[#allocation2 + $0x28] sm:$0xff]  ;;  %v2137_v7 = vld [vmem:[#allocation10 + $0x28] sm:$0xff]  ;;  %v2165_v21 = vld [vmem:[#allocation5] sm:$0xff] }
  0x48   :  { %265 = vmatmul.f32.gmra.mxu1 %v1981_v58  ;;  %306 = vmatmul.f32.gmra.mxu2 %v1981_v58  ;;  %2875 = vst [vmem:[#allocation30_spill] sm:$0xff] %v2097_v46  ;;  %v2131_v2 = vld [vmem:[#allocation10 + $0x40] sm:$0xff]  ;;  %v2148_v16 = vld [vmem:[#allocation2 + $0x38] sm:$0xff] }
  0x49   :  { %509 = vmatpush.msrb.mxu1 %v1985_v59  ;;  %529 = vmatpush.msrb.mxu2 %v1987_v60  ;;  %2876 = vst [vmem:[#allocation31_spill] sm:$0xff] %v2106_v54 }
  0x4a   :  { %382 = vmatmul.f32.vlgmr.msra.gmra.mxu3 %v1957_v43  ;;  %215 = vmatpush.msra.mxu0 %v164_v30  ;;  %2877 = vst [vmem:[#allocation32_spill] sm:$0xff] %v2123_v62  ;;  %v197_v30 = vld [vmem:[#allocation8] sm:$0x7] }
  0x4b   :  { %510 = vmatpush.msrb.mxu1 %v1993_v63  ;;  %530 = vmatpush.msrb.mxu2 %v1995_v0  ;;  %2878 = vst [vmem:[#allocation33_spill] sm:$0xff] %v2127_v1 }
  0x4c   :  { %545 = vmatpush.msrb.mxu3 %v2003_v4  ;;  %216 = vmatpush.msra.mxu0 %v161_v33  ;;  %2879 = vst [vmem:[#allocation34_spill] sm:$0xff] %v2131_v2 }
  0x4d   :  { %511 = vmatpush.msrb.mxu1 %v1999_v3  ;;  %531 = vmatpush.msrb.mxu2 %v2005_v5  ;;  %2880 = vst [vmem:[#allocation35_spill] sm:$0xff] %v2137_v7 }
  0x4e   :  { %546 = vmatpush.msrb.mxu3 %v2015_v9  ;;  %217 = vmatpush.msra.mxu0 %v158_v38  ;;  %2881 = vst [vmem:[#allocation36_spill] sm:$0xff] %v2144_v12  ;;  %v200_v38 = vperm.slane %v197_v30, 1 }
  0x4f   :  { %512 = vmatpush.msrb.mxu1 %v2007_v6  ;;  %532 = vmatpush.msrb.mxu2 %v2017_v10  ;;  %2882 = vst [vmem:[#allocation37_spill] sm:$0xff] %v2148_v16 }
  0x50   :  { %268 = vmatmul.f32.gmra.mxu1 %v2009_v8  ;;  %309 = vmatmul.f32.gmra.mxu2 %v2009_v8 }
  0x51   :  { %513 = vmatpush.msrb.mxu1 %v2020_v11  ;;  %547 = vmatpush.msrb.mxu3 %v2024_v13 }
  0x52   :  { %533 = vmatpush.msrb.mxu2 %v2026_v14  ;;  %385 = vmatmul.f32.gmra.mxu3 %v1981_v58 }
  0x53   :  { %514 = vmatpush.msrb.mxu1 %v2030_v15  ;;  %548 = vmatpush.msrb.mxu3 %v2037_v18 }
  0x54   :  { %534 = vmatpush.msrb.mxu2 %v2033_v17  ;;  %218 = vmatpush.msra.mxu0 %v155_v42 }
  0x55   :  { %515 = vmatpush.msrb.mxu1 %v2039_v19  ;;  %549 = vmatpush.msrb.mxu3 %v2050_v23 }
  0x56   :  { %535 = vmatpush.msrb.mxu2 %v2042_v20  ;;  %219 = vmatpush.msra.mxu0 %v152_v49 }
  0x57   :  { %516 = vmatpush.msrb.mxu1 %v2052_v24  ;;  %550 = vmatpush.msrb.mxu3 %v2059_v27 }
  0x58   :  { %271 = vmatmul.f32.gmra.mxu1 %v2044_v22  ;;  %312 = vmatmul.f32.gmra.mxu2 %v2044_v22 }
  0x59   :  { %536 = vmatpush.msrb.mxu2 %v2055_v25  ;;  %517 = vmatpush.msrb.mxu1 %v2061_v28 }
  0x5a   :  { %388 = vmatmul.f32.gmra.mxu3 %v2009_v8  ;;  %220 = vmatpush.msra.mxu0 %v149_v51  ;;  %v2254_v51 = vperm.slane %v197_v30, 2 }
  0x5b   :  { %537 = vmatpush.msrb.mxu2 %v2065_v29  ;;  %518 = vmatpush.msrb.mxu1 %v2068_v31 }
  0x5c   :  { %551 = vmatpush.msrb.mxu3 %v2072_v32  ;;  %221 = vmatmul.f32.vlgmr.msra.gmra.mxu0 %v1957_v43 }
  0x5d   :  { %538 = vmatpush.msrb.mxu2 %v2075_v34  ;;  %519 = vmatpush.msrb.mxu1 %v2077_v35 }
  0x5e   :  { %552 = vmatpush.msrb.mxu3 %v2084_v37 }
  0x5f   :  { %539 = vmatpush.msrb.mxu2 %v2088_v39  ;;  %520 = vmatpush.msrb.mxu1 %v2090_v40 }
  0x60   :  { %274 = vmatmul.f32.gmra.mxu1 %v2079_v36  ;;  %315 = vmatmul.f32.gmra.mxu2 %v2079_v36 }
  0x61   :  { %553 = vmatpush.msrb.mxu3 %v2094_v41  ;;  %540 = vmatpush.msrb.mxu2 %v2097_v46 }
  0x62   :  { %612 = vmatpush.msra.mxu1 %v1959_v44  ;;  %391 = vmatmul.f32.gmra.mxu3 %v2044_v22 }
  0x63   :  { %554 = vmatpush.msrb.mxu3 %v2102_v50  ;;  %632 = vmatpush.msra.mxu2 %v1961_v45 }
  0x64   :  { %613 = vmatpush.msra.mxu1 %v1965_v47  ;;  %224 = vmatmul.f32.gmra.mxu0 %v1981_v58 }
  0x65   :  { %555 = vmatpush.msrb.mxu3 %v2110_v55  ;;  %633 = vmatpush.msra.mxu2 %v1967_v48 }
  0x66   :  { %614 = vmatpush.msra.mxu1 %v1971_v52 }
  0x67   :  { %556 = vmatpush.msrb.mxu3 %v2116_v61  ;;  %634 = vmatpush.msra.mxu2 %v1973_v53 }
  0x68   :  { %277 = vmatmul.f32.gmra.mxu1 %v2106_v54  ;;  %318 = vmatmul.f32.gmra.mxu2 %v2106_v54 }
  0x69   :  { %615 = vmatpush.msra.mxu1 %v1977_v56  ;;  %557 = vmatpush.msrb.mxu3 %v2123_v62 }
  0x6a   :  { %394 = vmatmul.f32.gmra.mxu3 %v2079_v36  ;;  %635 = vmatpush.msra.mxu2 %v1979_v57 }
  0x6b   :  { %616 = vmatpush.msra.mxu1 %v1985_v59  ;;  %558 = vmatpush.msrb.mxu3 %v2131_v2 }
  0x6c   :  { %636 = vmatpush.msra.mxu2 %v1987_v60  ;;  %227 = vmatmul.f32.gmra.mxu0 %v2009_v8 }
  0x6d   :  { %617 = vmatpush.msra.mxu1 %v1993_v63  ;;  %559 = vmatpush.msrb.mxu3 %v2137_v7 }
  0x6e   :  { %637 = vmatpush.msra.mxu2 %v1995_v0 }
  0x6f   :  { %618 = vmatpush.msra.mxu1 %v1999_v3  ;;  %560 = vmatpush.msrb.mxu3 %v2144_v12 }
  0x70   :  { %280 = vmatmul.f32.gmra.mxu1 %v2127_v1  ;;  %321 = vmatmul.f32.gmra.mxu2 %v2127_v1 }
  0x71   :  { %638 = vmatpush.msra.mxu2 %v2005_v5  ;;  %619 = vmatpush.msra.mxu1 %v2007_v6 }
  0x72   :  { %397 = vmatmul.f32.gmra.mxu3 %v2106_v54 }
  0x73   :  { %652 = vmatpush.msra.mxu3 %v2003_v4  ;;  %639 = vmatpush.msra.mxu2 %v2017_v10 }
  0x74   :  { %620 = vmatpush.msra.mxu1 %v2020_v11  ;;  %230 = vmatmul.f32.gmra.mxu0 %v2044_v22 }
  0x75   :  { %653 = vmatpush.msra.mxu3 %v2015_v9  ;;  %640 = vmatpush.msra.mxu2 %v2026_v14 }
  0x76   :  { %621 = vmatpush.msra.mxu1 %v2030_v15 }
  0x77   :  { %654 = vmatpush.msra.mxu3 %v2024_v13  ;;  %641 = vmatpush.msra.mxu2 %v2033_v17 }
  0x78   :  { %283 = vmatmul.f32.gmra.mxu1 %v2148_v16  ;;  %324 = vmatmul.f32.gmra.mxu2 %v2148_v16 }
  0x79   :  { %622 = vmatpush.msra.mxu1 %v2039_v19  ;;  %655 = vmatpush.msra.mxu3 %v2037_v18 }
  0x7a   :  { %400 = vmatmul.f32.gmra.mxu3 %v2127_v1  ;;  %642 = vmatpush.msra.mxu2 %v2042_v20 }
  0x7b   :  { %623 = vmatpush.msra.mxu1 %v2052_v24  ;;  %656 = vmatpush.msra.mxu3 %v2050_v23 }
  0x7c   :  { %643 = vmatpush.msra.mxu2 %v2055_v25  ;;  %233 = vmatmul.f32.gmra.mxu0 %v2079_v36 }
  0x7d   :  { %624 = vmatpush.msra.mxu1 %v2061_v28  ;;  %657 = vmatpush.msra.mxu3 %v2059_v27 }
  0x7e   :  { %644 = vmatpush.msra.mxu2 %v2065_v29 }
  0x7f   :  { %625 = vmatpush.msra.mxu1 %v2068_v31  ;;  %658 = vmatpush.msra.mxu3 %v2072_v32 }
  0x80   :  { %521 = vmatmul.f32.vlgmr.msrb.gmra.mxu1 %v2165_v21  ;;  %541 = vmatmul.f32.vlgmr.msrb.gmra.mxu2 %v2165_v21 }
  0x81   :  { %645 = vmatpush.msra.mxu2 %v2075_v34  ;;  %626 = vmatpush.msra.mxu1 %v2077_v35 }
  0x82   :  { %403 = vmatmul.f32.gmra.mxu3 %v2148_v16 }
  0x83   :  { %646 = vmatpush.msra.mxu2 %v2088_v39  ;;  %659 = vmatpush.msra.mxu3 %v2084_v37 }
  0x84   :  { %627 = vmatpush.msra.mxu1 %v2090_v40  ;;  %236 = vmatmul.f32.gmra.mxu0 %v2106_v54 }
  0x85   :  { %647 = vmatpush.msra.mxu2 %v2097_v46  ;;  %660 = vmatpush.msra.mxu3 %v2094_v41 }
  0x86   :  { %739 = vmatpush.msrb.mxu1 %v1961_v45 }
  0x87   :  { %759 = vmatpush.msrb.mxu2 %v2003_v4  ;;  %661 = vmatpush.msra.mxu3 %v2102_v50 }
  0x88   :  { %740 = vmatpush.msrb.mxu1 %v1967_v48 }
  0x89   :  { %760 = vmatpush.msrb.mxu2 %v2015_v9  ;;  %662 = vmatpush.msra.mxu3 %v2110_v55 }
  0x8a   :  { %561 = vmatmul.f32.vlgmr.msrb.gmra.mxu3 %v2165_v21  ;;  %741 = vmatpush.msrb.mxu1 %v1973_v53 }
  0x8b   :  { %761 = vmatpush.msrb.mxu2 %v2024_v13  ;;  %663 = vmatpush.msra.mxu3 %v2116_v61 }
  0x8c   :  { %742 = vmatpush.msrb.mxu1 %v1979_v57  ;;  %239 = vmatmul.f32.gmra.mxu0 %v2127_v1 }
  0x8d   :  { %762 = vmatpush.msrb.mxu2 %v2037_v18  ;;  %664 = vmatpush.msra.mxu3 %v2123_v62 }
  0x8e   :  { %743 = vmatpush.msrb.mxu1 %v1987_v60 }
  0x8f   :  { %763 = vmatpush.msrb.mxu2 %v2050_v23  ;;  %665 = vmatpush.msra.mxu3 %v2131_v2 }
  0x90   :  { %744 = vmatpush.msrb.mxu1 %v1995_v0 }
  0x91   :  { %764 = vmatpush.msrb.mxu2 %v2059_v27  ;;  %666 = vmatpush.msra.mxu3 %v2137_v7 }
  0x92   :  { %745 = vmatpush.msrb.mxu1 %v2005_v5 }
  0x93   :  { %765 = vmatpush.msrb.mxu2 %v2072_v32  ;;  %667 = vmatpush.msra.mxu3 %v2144_v12 }
  0x94   :  { %746 = vmatpush.msrb.mxu1 %v2017_v10  ;;  %242 = vmatmul.f32.gmra.mxu0 %v2148_v16 }
  0x95   :  { %766 = vmatpush.msrb.mxu2 %v2084_v37  ;;  %826 = vmatpush.msrb.mxu3 %v1959_v44 }
  0x96   :  { %747 = vmatpush.msrb.mxu1 %v2026_v14 }
  0x97   :  { %767 = vmatpush.msrb.mxu2 %v2094_v41  ;;  %827 = vmatpush.msrb.mxu3 %v1965_v47 }
  0x98   :  { %748 = vmatpush.msrb.mxu1 %v2033_v17 }
  0x99   :  { %768 = vmatpush.msrb.mxu2 %v2102_v50  ;;  %828 = vmatpush.msrb.mxu3 %v1971_v52 }
  0x9a   :  { %749 = vmatpush.msrb.mxu1 %v2042_v20  ;;  %v343_v20 = vld [vmem:[#allocation11 + $0x78] sm:$0xff] }
  0x9b   :  { %769 = vmatpush.msrb.mxu2 %v2110_v55  ;;  %829 = vmatpush.msrb.mxu3 %v1977_v56 }
  0x9c   :  { %750 = vmatpush.msrb.mxu1 %v2055_v25 }
  0x9d   :  { %770 = vmatpush.msrb.mxu2 %v2116_v61  ;;  %830 = vmatpush.msrb.mxu3 %v1985_v59 }
  0x9e   :  { %751 = vmatpush.msrb.mxu1 %v2065_v29 }
  0x9f   :  { %771 = vmatpush.msrb.mxu2 %v2123_v62  ;;  %831 = vmatpush.msrb.mxu3 %v1993_v63 }
  0xa0   :  { %752 = vmatpush.msrb.mxu1 %v2075_v34 }
  0xa1   :  { %772 = vmatpush.msrb.mxu2 %v2131_v2  ;;  %832 = vmatpush.msrb.mxu3 %v1999_v3 }
  0xa2   :  { %753 = vmatpush.msrb.mxu1 %v2088_v39 }
  0xa3   :  { %773 = vmatpush.msrb.mxu2 %v2137_v7  ;;  %833 = vmatpush.msrb.mxu3 %v2007_v6 }
  0xa4   :  { %754 = vmatpush.msrb.mxu1 %v2097_v46 }
  0xa5   :  { %774 = vmatpush.msrb.mxu2 %v2144_v12  ;;  %834 = vmatpush.msrb.mxu3 %v2020_v11 }
  0xa7   :  { %835 = vmatpush.msrb.mxu3 %v2030_v15 }
  0xa9   :  { %836 = vmatpush.msrb.mxu3 %v2039_v19 }
  0xab   :  { %837 = vmatpush.msrb.mxu3 %v2052_v24 }
  0xad   :  { %838 = vmatpush.msrb.mxu3 %v2061_v28 }
  0xaf   :  { %839 = vmatpush.msrb.mxu3 %v2068_v31 }
  0xb1   :  { %840 = vmatpush.msrb.mxu3 %v2077_v35 }
  0xb3   :  { %841 = vmatpush.msrb.mxu3 %v2090_v40 }
  0xbd   :  { %v263_v26 = vpop.f32.mrf.mxu1 }
  0xbe   :  { %v264_v25 = vadd.f32 %v263_v26, %v200_v38 }
  0xc3   :  { %v2250_v33 = vpop.f32.mrf.mxu2 }
  0xc5   :  { %v266_v42 = vpop.f32.mrf.mxu1 }
  0xc6   :  { %v2252_v49 = vadd.f32 %v266_v42, %v200_v38 }
  0xc8   :  { %2883 = vst [vmem:[#allocation38_spill] sm:$0xff] %v2252_v49 }
  0xcb   :  { %v307_v16 = vpop.f32.mrf.mxu2 }
  0xcc   :  { %v2257_v1 = vadd.f32 %v307_v16, %v2254_v51 }
  0xcd   :  { %v269_v54 = vpop.f32.mrf.mxu1  ;;  %v2261_v39 = vpop.f32.mrf.mxu3 }
  0xce   :  { %2884 = vst [vmem:[#allocation39_spill] sm:$0xff] %v2257_v1  ;;  %v2259_v46 = vadd.f32 %v269_v54, %v200_v38 }
  0xcf   :  { %2886 = vst [vmem:[#allocation41_spill] sm:$0xff] %v2261_v39 }
  0xd0   :  { %2885 = vst [vmem:[#allocation40_spill] sm:$0xff] %v2259_v46 }
  0xd3   :  { %v310_v36 = vpop.f32.mrf.mxu2 }
  0xd4   :  { %v2264_v34 = vadd.f32 %v310_v36, %v2254_v51 }
  0xd5   :  { %v272_v40 = vpop.f32.mrf.mxu1  ;;  %v2268_v42 = vpop.f32.mrf.mxu3 }
  0xd6   :  { %2887 = vst [vmem:[#allocation42_spill] sm:$0xff] %v2264_v34  ;;  %v2266_v12 = vadd.f32 %v272_v40, %v200_v38 }
  0xd7   :  { %2889 = vst [vmem:[#allocation44_spill] sm:$0xff] %v2268_v42 }
  0xd8   :  { %2888 = vst [vmem:[#allocation43_spill] sm:$0xff] %v2266_v12 }
  0xdb   :  { %v313_v49 = vpop.f32.mrf.mxu2 }
  0xdc   :  { %v2271_v29 = vadd.f32 %v313_v49, %v2254_v51 }
  0xdd   :  { %v275_v16 = vpop.f32.mrf.mxu1  ;;  %v2275_v54 = vpop.f32.mrf.mxu3 }
  0xde   :  { %2890 = vst [vmem:[#allocation45_spill] sm:$0xff] %v2271_v29  ;;  %v2273_v1 = vadd.f32 %v275_v16, %v200_v38 }
  0xdf   :  { %2892 = vst [vmem:[#allocation47_spill] sm:$0xff] %v2275_v54 }
  0xe0   :  { %2891 = vst [vmem:[#allocation46_spill] sm:$0xff] %v2273_v1 }
  0xe3   :  { %v316_v46 = vpop.f32.mrf.mxu2 }
  0xe4   :  { %v2278_v39 = vadd.f32 %v316_v46, %v2254_v51 }
  0xe5   :  { %v278_v36 = vpop.f32.mrf.mxu1  ;;  %v2282_v40 = vpop.f32.mrf.mxu3 }
  0xe6   :  { %2893 = vst [vmem:[#allocation48_spill] sm:$0xff] %v2278_v39  ;;  %v2280_v34 = vadd.f32 %v278_v36, %v200_v38  ;;  %v496_v36 = vld [vmem:[%s2806_s5] sm:$0x7] }
  0xe7   :  { %2895 = vst [vmem:[#allocation50_spill] sm:$0xff] %v2282_v40 }
  0xe8   :  { %2894 = vst [vmem:[#allocation49_spill] sm:$0xff] %v2280_v34  ;;  %v2299_v34 = vperm.slane %v197_v30, 0 }
  0xea   :  { %2901 = vst [vmem:[#allocation56_spill] sm:$0xff] %v2299_v34 }
  0xeb   :  { %v319_v12 = vpop.f32.mrf.mxu2 }
  0xec   :  { %v2285_v42 = vadd.f32 %v319_v12, %v2254_v51  ;;  %v222_v12 = vpop.f32.mrf.mxu0 }
  0xed   :  { %v281_v49 = vpop.f32.mrf.mxu1  ;;  %v2289_v16 = vpop.f32.mrf.mxu3 }
  0xee   :  { %2896 = vst [vmem:[#allocation51_spill] sm:$0xff] %v2285_v42  ;;  %v2287_v29 = vadd.f32 %v281_v49, %v200_v38  ;;  %v2303_v49 = vperm.slane %v496_v36, 0 }
  0xef   :  { %2898 = vst [vmem:[#allocation53_spill] sm:$0xff] %v2289_v16  ;;  %v2310_v16 = vperm.slane %v496_v36, 1 }
  0xf0   :  { %2897 = vst [vmem:[#allocation52_spill] sm:$0xff] %v2287_v29 }
  0xf1   :  { %2903 = vst [vmem:[#allocation58_spill] sm:$0xff] %v2303_v49 }
  0xf2   :  { %2905 = vst [vmem:[#allocation60_spill] sm:$0xff] %v2310_v16 }
  0xf3   :  { %v322_v1 = vpop.f32.mrf.mxu2 }
  0xf4   :  { %v2292_v54 = vadd.f32 %v322_v1, %v2254_v51  ;;  %v223_v1 = vadd.f32 %v222_v12, %v2299_v34  ;;  %v345_v34 = vld [vmem:[#allocation11 + $0x88] sm:$0xff] }
  0xf5   :  { %v284_v46 = vpop.f32.mrf.mxu1  ;;  %v2301_v42 = vpop.f32.mrf.mxu3 }
  0xf6   :  { %2899 = vst [vmem:[#allocation54_spill] sm:$0xff] %v2292_v54  ;;  %v2294_v39 = vadd.f32 %v284_v46, %v200_v38  ;;  %v349_v38 = vld [vmem:[#allocation11 + $0xa8] sm:$0xff] }
  0xf7   :  { %2902 = vst [vmem:[#allocation57_spill] sm:$0xff] %v2301_v42 }
  0xf8   :  { %2900 = vst [vmem:[#allocation55_spill] sm:$0xff] %v2294_v39 }
  0xfb   :  { %v325_v29 = vpop.f32.mrf.mxu2 }
  0xfc   :  { %v2306_v40 = vadd.f32 %v325_v29, %v2254_v51 }
  0xfd   :  { %v522_v54 = vpop.f32.mrf.mxu1  ;;  %v2312_v7 = vpop.f32.mrf.mxu3 }
  0xfe   :  { %2904 = vst [vmem:[#allocation59_spill] sm:$0xff] %v2306_v40  ;;  %v523_v46 = vadd.f32 %v522_v54, %v2303_v49  ;;  %v359_v54 = vld [vmem:[#allocation11 + $0xf8] sm:$0xff] }
  0xff   :  { %2906 = vst [vmem:[#allocation61_spill] sm:$0xff] %v2312_v7  ;;  %407 = vmatpush.msrb.mxu0 %v359_v54  ;;  %v353_v7 = vld [vmem:[#allocation11 + $0xc8] sm:$0xff] }
 0x100   :  { %v565_v39 = vadd.f32 %v523_v46, %v223_v1  ;;  %v357_v1 = vld [vmem:[#allocation11 + $0xe8] sm:$0xff] }
 0x101   :  { %408 = vmatpush.msrb.mxu0 %v357_v1 }
 0x102   :  { %v1497_v35 = vmul.f32 -1.442695, %v565_v39  ;;  %v355_v39 = vld [vmem:[#allocation11 + $0xd8] sm:$0xff] }
 0x103   :  { %v542_v30 = vpop.f32.mrf.mxu2  ;;  %409 = vmatpush.msrb.mxu0 %v355_v39 }
 0x104   :  { %1529 = vpow2.f32 %v1497_v35  ;;  %v543_v42 = vadd.f32 %v542_v30, %v2310_v16 }
 0x105   :  { %v2315_v12 = vpop.f32.mrf.mxu3  ;;  %410 = vmatpush.msrb.mxu0 %v353_v7 }
 0x106   :  { %v566_v31 = vadd.f32 %v543_v42, %v264_v25  ;;  %2907 = vst [vmem:[#allocation62_spill] sm:$0xff] %v2315_v12  ;;  %v351_v25 = vld [vmem:[#allocation11 + $0xb8] sm:$0xff] }
 0x107   :  { %411 = vmatpush.msrb.mxu0 %v351_v25  ;;  %v347_v12 = vld [vmem:[#allocation11 + $0x98] sm:$0xff]  ;;  %v305_v25 = vadd.f32 %v2250_v33, %v2254_v51  ;;  %v333_v51 = vld [vmem:[#allocation11 + $0x28] sm:$0xff] }
 0x108   :  { %v1498_v2 = vmul.f32 -1.442695, %v566_v31  ;;  %v2317_v31 = vperm.slane %v496_v36, 2  ;;  %v335_v33 = vld [vmem:[#allocation11 + $0x38] sm:$0xff] }
 0x109   :  { %412 = vmatpush.msrb.mxu0 %v349_v38 }
 0x10a   :  { %v1530_v29 = vpop.eup %1529  ;;  %1531 = vpow2.f32 %v1498_v2  ;;  %2908 = vst [vmem:[#allocation63_spill] sm:$0xff] %v2317_v31 }
 0x10b   :  { %v573_v40 = vadd.f32 1.0, %v1530_v29  ;;  %413 = vmatpush.msrb.mxu0 %v347_v12  ;;  %v339_v12 = vld [vmem:[#allocation11 + $0x58] sm:$0xff] }
 0x10d   :  { %1533 = vrcp.f32 %v573_v40  ;;  %v562_v42 = vpop.f32.mrf.mxu3  ;;  %v586_v30 = vand.u32 2147483648, %v573_v40  ;;  %v584_v54 = vand.u32 2147483647, %v573_v40  ;;  %vm580_vm1 = vweird.f32 %v573_v40  ;;  %414 = vmatpush.msrb.mxu0 %v345_v34 }
 0x10e   :  { %v563_v16 = vadd.f32 %v562_v42, %v2317_v31  ;;  %v341_v42 = vld [vmem:[#allocation11 + $0x68] sm:$0xff] }
 0x10f   :  { %v587_v7 = vor.u32 1.1754944e-38, %v586_v30  ;;  %vm585_vm3 = vcmp.eq.f32.partialorder %v584_v54, 8.507059e+37  ;;  %415 = vmatpush.msrb.mxu0 %v343_v20  ;;  %v337_v54 = vld [vmem:[#allocation11 + $0x48] sm:$0xff]  ;;  %v331_v20 = vld [vmem:[#allocation11 + $0x18] sm:$0xff] }
 0x110   :  { %v1532_v46 = vpop.eup %1531 }
 0x111   :  { %v574_v49 = vadd.f32 1.0, %v1532_v46  ;;  %416 = vmatpush.msrb.mxu0 %v341_v42 }
 0x113   :  { %v1534_v26 = vpop.eup %1533  ;;  %1535 = vrcp.f32 %v574_v49  ;;  %v601_v62 = vand.u32 2147483648, %v574_v49  ;;  %vm595_vm5 = vweird.f32 %v574_v49  ;;  %417 = vmatpush.msrb.mxu0 %v339_v12 }
 0x114   :  { %v576_v35 = vmul.f32 %v1534_v26, %v573_v40  ;;  %vm581_vm0 = vweird.f32 %v1534_v26 }
 0x115   :  { %vm582_vm2 = vmor %vm580_vm1, %vm581_vm0  ;;  %v602_v30 = vor.u32 1.1754944e-38, %v601_v62  ;;  %418 = vmatpush.msrb.mxu0 %v337_v54  ;;  %v2929_v62 = vld [vmem:[#allocation60_spill] sm:$0xff] }
 0x116   :  { %v577_v2 = vsub.f32 1.0, %v576_v35 }
 0x117   :  { %419 = vmatpush.msrb.mxu0 %v335_v33 }
 0x118   :  { %v578_v29 = vmul.f32 %v1534_v26, %v577_v2 }
 0x119   :  { %v1536_v46 = vpop.eup %1535  ;;  %420 = vmatpush.msrb.mxu0 %v333_v51 }
 0x11a   :  { %v591_v1 = vmul.f32 %v1536_v46, %v574_v49  ;;  %v579_v39 = vadd.f32 %v1534_v26, %v578_v29  ;;  %vm596_vm4 = vweird.f32 %v1536_v46  ;;  %v599_v29 = vand.u32 2147483647, %v574_v49 }
 0x11b   :  { %vm597_vm6 = vmor %vm595_vm5, %vm596_vm4  ;;  %421 = vmatpush.msrb.mxu0 %v331_v20  ;;  %v2931_v20 = vld [vmem:[#allocation63_spill] sm:$0xff] }
 0x11c   :  { %v592_v36 = vsub.f32 1.0, %v591_v1  ;;  %v583_v35 = vsel %vm582_vm2, %v1534_v26, %v579_v39  ;;  %vm600_vm7 = vcmp.eq.f32.partialorder %v599_v29, 8.507059e+37 }
 0x11d   :  { %v588_v2 = vsel %vm585_vm3, %v587_v7, %v583_v35 }
 0x11e   :  { %v605_v28 = vmul.f32 %v588_v2, %v563_v16  ;;  %v593_v38 = vmul.f32 %v1536_v46, %v592_v36 }
 0x120   :  { %v606_v40 = vadd.f32 %v605_v28, %v305_v25  ;;  %v594_v31 = vadd.f32 %v1536_v46, %v593_v38 }
 0x122   :  { %1537 = vtanh.f32 %v606_v40  ;;  %v598_v26 = vsel %vm597_vm6, %v1536_v46, %v594_v31  ;;  %v329_v31 = vld [vmem:[#allocation11 + $0x8] sm:$0xff]  ;;  %v2930_v46 = vld [vmem:[#allocation38_spill] sm:$0xff] }
 0x123   :  { %v603_v34 = vsel %vm600_vm7, %v602_v30, %v598_v26  ;;  %422 = vmatpush.msrb.mxu0 %v329_v31 }
 0x124   :  { %v608_v16 = vsub.f32 1.0, %v603_v34  ;;  %v610_v49 = vmul.f32 %v603_v34, %v2165_v21  ;;  %423 = vmatmul.f32.vlgmr.msrb.gmra.mxu0 %v1957_v43  ;;  %v2909_v43 = vld [vmem:[#allocation32_spill] sm:$0xff] }
 0x125   :  { %719 = vmatpush.msra.mxu0 %v1959_v44 }
 0x127   :  { %720 = vmatpush.msra.mxu0 %v1965_v47 }
 0x128   :  { %v1538_v1 = vpop.eup %1537 }
 0x129   :  { %v609_v28 = vmul.f32 %v1538_v1, %v608_v16  ;;  %721 = vmatpush.msra.mxu0 %v1971_v52 }
 0x12b   :  { %v2323_v39 = vadd.f32 %v610_v49, %v609_v28  ;;  %722 = vmatpush.msra.mxu0 %v1977_v56 }
 0x12c   :  { %426 = vmatmul.f32.gmra.mxu0 %v1981_v58  ;;  %v2914_v58 = vld [vmem:[#allocation21_spill] sm:$0xff] }
 0x12d   :  { %628 = vmatmul.f32.vlgmr.msra.gmra.mxu1 %v2323_v39  ;;  %648 = vmatmul.f32.vlgmr.msra.gmra.mxu2 %v2323_v39 }
 0x12e   :  { %668 = vmatmul.f32.vlgmr.msra.gmra.mxu3 %v2323_v39  ;;  %866 = vmatpush.msra.mxu1 %v2003_v4  ;;  %v2918_v4 = vld [vmem:[#allocation36_spill] sm:$0xff] }
 0x12f   :  { %933 = vmatpush.msra.mxu2 %v1959_v44  ;;  %953 = vmatpush.msra.mxu3 %v1961_v45  ;;  %v2910_v44 = vld [vmem:[#allocation22_spill] sm:$0xff] }
 0x130   :  { %867 = vmatpush.msra.mxu1 %v2015_v9  ;;  %723 = vmatpush.msra.mxu0 %v1985_v59 }
 0x131   :  { %934 = vmatpush.msra.mxu2 %v1965_v47  ;;  %954 = vmatpush.msra.mxu3 %v1967_v48  ;;  %v2911_v47 = vld [vmem:[#allocation20_spill] sm:$0xff] }
 0x132   :  { %868 = vmatpush.msra.mxu1 %v2024_v13  ;;  %724 = vmatpush.msra.mxu0 %v1993_v63 }
 0x133   :  { %935 = vmatpush.msra.mxu2 %v1971_v52  ;;  %955 = vmatpush.msra.mxu3 %v1973_v53  ;;  %v2912_v52 = vld [vmem:[#allocation34_spill] sm:$0xff] }
 0x134   :  { %869 = vmatpush.msra.mxu1 %v2037_v18  ;;  %725 = vmatpush.msra.mxu0 %v1999_v3 }
 0x135   :  { %936 = vmatpush.msra.mxu2 %v1977_v56  ;;  %956 = vmatpush.msra.mxu3 %v1979_v57  ;;  %v2913_v56 = vld [vmem:[#allocation24_spill] sm:$0xff] }
 0x136   :  { %870 = vmatpush.msra.mxu1 %v2050_v23  ;;  %726 = vmatpush.msra.mxu0 %v2007_v6 }
 0x137   :  { %937 = vmatpush.msra.mxu2 %v1985_v59  ;;  %957 = vmatpush.msra.mxu3 %v1987_v60  ;;  %v2915_v59 = vld [vmem:[#allocation35_spill] sm:$0xff] }
 0x138   :  { %871 = vmatpush.msra.mxu1 %v2059_v27  ;;  %429 = vmatmul.f32.gmra.mxu0 %v2009_v8  ;;  %v2920_v8 = vld [vmem:[#allocation25_spill] sm:$0xff] }
 0x139   :  { %938 = vmatpush.msra.mxu2 %v1993_v63  ;;  %958 = vmatpush.msra.mxu3 %v1995_v0  ;;  %v2916_v63 = vld [vmem:[#allocation26_spill] sm:$0xff] }
 0x13a   :  { %872 = vmatpush.msra.mxu1 %v2072_v32  ;;  %727 = vmatpush.msra.mxu0 %v2020_v11 }
 0x13b   :  { %939 = vmatpush.msra.mxu2 %v1999_v3  ;;  %959 = vmatpush.msra.mxu3 %v2005_v5  ;;  %v2917_v3 = vld [vmem:[#allocation23_spill] sm:$0xff] }
 0x13c   :  { %873 = vmatpush.msra.mxu1 %v2084_v37  ;;  %728 = vmatpush.msra.mxu0 %v2030_v15 }
 0x13d   :  { %940 = vmatpush.msra.mxu2 %v2007_v6  ;;  %960 = vmatpush.msra.mxu3 %v2017_v10  ;;  %v2919_v6 = vld [vmem:[#allocation29_spill] sm:$0xff] }
 0x13e   :  { %874 = vmatpush.msra.mxu1 %v2094_v41  ;;  %729 = vmatpush.msra.mxu0 %v2039_v19 }
 0x13f   :  { %941 = vmatpush.msra.mxu2 %v2020_v11  ;;  %961 = vmatpush.msra.mxu3 %v2026_v14  ;;  %v2921_v11 = vld [vmem:[#allocation27_spill] sm:$0xff] }
 0x140   :  { %875 = vmatpush.msra.mxu1 %v2102_v50  ;;  %730 = vmatpush.msra.mxu0 %v2052_v24 }
 0x141   :  { %942 = vmatpush.msra.mxu2 %v2030_v15  ;;  %962 = vmatpush.msra.mxu3 %v2033_v17  ;;  %v2922_v15 = vld [vmem:[#allocation28_spill] sm:$0xff] }
 0x142   :  { %876 = vmatpush.msra.mxu1 %v2110_v55  ;;  %432 = vmatmul.f32.gmra.mxu0 %v2044_v22  ;;  %v2924_v22 = vld [vmem:[#allocation31_spill] sm:$0xff] }
 0x143   :  { %943 = vmatpush.msra.mxu2 %v2039_v19  ;;  %731 = vmatpush.msra.mxu0 %v2910_v44  ;;  %v2923_v19 = vld [vmem:[#allocation30_spill] sm:$0xff] }
 0x144   :  { %877 = vmatpush.msra.mxu1 %v2116_v61  ;;  %963 = vmatpush.msra.mxu3 %v2911_v47 }
 0x145   :  { %944 = vmatpush.msra.mxu2 %v2052_v24  ;;  %732 = vmatpush.msra.mxu0 %v2913_v56 }
 0x146   :  { %878 = vmatpush.msra.mxu1 %v2909_v43  ;;  %964 = vmatpush.msra.mxu3 %v2914_v58 }
 0x147   :  { %945 = vmatpush.msra.mxu2 %v2910_v44  ;;  %733 = vmatpush.msra.mxu0 %v2916_v63 }
 0x148   :  { %879 = vmatpush.msra.mxu1 %v2912_v52  ;;  %965 = vmatpush.msra.mxu3 %v2917_v3 }
 0x149   :  { %946 = vmatpush.msra.mxu2 %v2913_v56  ;;  %734 = vmatpush.msra.mxu0 %v2919_v6 }
 0x14a   :  { %880 = vmatpush.msra.mxu1 %v2915_v59  ;;  %966 = vmatpush.msra.mxu3 %v2920_v8 }
 0x14b   :  { %435 = vmatmul.f32.gmra.mxu0 %v2921_v11  ;;  %947 = vmatpush.msra.mxu2 %v2916_v63 }
 0x14c   :  { %881 = vmatpush.msra.mxu1 %v2918_v4  ;;  %846 = vmatpush.msrb.mxu0 %v1961_v45  ;;  %v2925_v45 = vld [vmem:[#allocation33_spill] sm:$0xff] }
 0x14d   :  { %967 = vmatpush.msra.mxu3 %v2922_v15  ;;  %948 = vmatpush.msra.mxu2 %v2919_v6 }
 0x14e   :  { %847 = vmatpush.msrb.mxu0 %v1967_v48  ;;  %v2926_v48 = vld [vmem:[#allocation37_spill] sm:$0xff] }
 0x14f   :  { %968 = vmatpush.msra.mxu3 %v2923_v19 }
 0x150   :  { %848 = vmatpush.msrb.mxu0 %v1973_v53  ;;  %v225_v53 = vpop.f32.mrf.mxu0 }
 0x152   :  { %849 = vmatpush.msrb.mxu0 %v1979_v57  ;;  %v2927_v57 = vld [vmem:[#allocation56_spill] sm:$0xff] }
 0x153   :  { %438 = vmatmul.f32.gmra.mxu0 %v2924_v22 }
 0x154   :  { %850 = vmatpush.msrb.mxu0 %v1987_v60  ;;  %v226_v60 = vadd.f32 %v225_v53, %v2927_v57  ;;  %v2932_v53 = vld [vmem:[#allocation39_spill] sm:$0xff] }
 0x156   :  { %851 = vmatpush.msrb.mxu0 %v1995_v0 }
 0x158   :  { %852 = vmatpush.msrb.mxu0 %v2005_v5  ;;  %v2928_v5 = vld [vmem:[#allocation58_spill] sm:$0xff] }
 0x15a   :  { %853 = vmatpush.msrb.mxu0 %v2017_v10 }
 0x15b   :  { %441 = vmatmul.f32.gmra.mxu0 %v2925_v45  ;;  %v2421_v45 = vpop.f32.mrf.mxu0 }
 0x15c   :  { %854 = vmatpush.msrb.mxu0 %v2026_v14 }
 0x15e   :  { %855 = vmatpush.msrb.mxu0 %v2033_v17 }
 0x160   :  { %856 = vmatpush.msrb.mxu0 %v2911_v47 }
 0x162   :  { %857 = vmatpush.msrb.mxu0 %v2914_v58 }
 0x163   :  { %444 = vmatmul.f32.gmra.mxu0 %v2926_v48 }
 0x164   :  { %858 = vmatpush.msrb.mxu0 %v2917_v3 }
 0x166   :  { %859 = vmatpush.msrb.mxu0 %v2920_v8 }
 0x168   :  { %860 = vmatpush.msrb.mxu0 %v2922_v15 }
 0x16a   :  { %861 = vmatpush.msrb.mxu0 %v2923_v19 }
 0x1aa   :  { %v629_v0 = vpop.f32.mrf.mxu1 }
 0x1ab   :  { %v630_v10 = vadd.f32 %v629_v0, %v2928_v5 }
 0x1ad   :  { %v672_v14 = vadd.f32 %v630_v10, %v226_v60 }
 0x1af   :  { %v1499_v17 = vmul.f32 -1.442695, %v672_v14 }
 0x1b0   :  { %v649_v24 = vpop.f32.mrf.mxu2 }
 0x1b1   :  { %1539 = vpow2.f32 %v1499_v17  ;;  %v650_v21 = vadd.f32 %v649_v24, %v2929_v62  ;;  %v669_v34 = vpop.f32.mrf.mxu3 }
 0x1b2   :  { %v670_v28 = vadd.f32 %v669_v34, %v2931_v20  ;;  %v2482_v34 = vld [vmem:[#allocation10 + $0xd8] sm:$0xff] }
 0x1b3   :  { %v673_v7 = vadd.f32 %v650_v21, %v2930_v46  ;;  %v2424_v46 = vpop.f32.mrf.mxu0 }
 0x1b5   :  { %v1500_v36 = vmul.f32 -1.442695, %v673_v7 }
 0x1b7   :  { %v1540_v35 = vpop.eup %1539  ;;  %1541 = vpow2.f32 %v1500_v36 }
 0x1b8   :  { %v680_v25 = vadd.f32 1.0, %v1540_v35 }
 0x1ba   :  { %1543 = vrcp.f32 %v680_v25  ;;  %v693_v12 = vand.u32 2147483648, %v680_v25  ;;  %v691_v30 = vand.u32 2147483647, %v680_v25  ;;  %vm687_vm9 = vweird.f32 %v680_v25 }
 0x1bc   :  { %v694_v16 = vor.u32 1.1754944e-38, %v693_v12  ;;  %vm692_vm11 = vcmp.eq.f32.partialorder %v691_v30, 8.507059e+37  ;;  %v2454_v12 = vld [vmem:[#allocation10 + $0x138] sm:$0xff]  ;;  %v2468_v30 = vld [vmem:[#allocation10 + $0x108] sm:$0xff] }
 0x1bd   :  { %v1542_v2 = vpop.eup %1541 }
 0x1be   :  { %v681_v38 = vadd.f32 1.0, %v1542_v2  ;;  %v2435_v2 = vld [vmem:[#allocation10 + $0x170] sm:$0xff] }
 0x1c0   :  { %v1544_v42 = vpop.eup %1543  ;;  %1545 = vrcp.f32 %v681_v38  ;;  %v708_v22 = vand.u32 2147483648, %v681_v38  ;;  %v706_v48 = vand.u32 2147483647, %v681_v38  ;;  %vm702_vm13 = vweird.f32 %v681_v38 }
 0x1c1   :  { %v683_v29 = vmul.f32 %v1544_v42, %v680_v25  ;;  %vm688_vm8 = vweird.f32 %v1544_v42  ;;  %v2432_v25 = vld [vmem:[#allocation10 + $0x178] sm:$0xff] }
 0x1c2   :  { %vm689_vm10 = vmor %vm687_vm9, %vm688_vm8  ;;  %v709_v14 = vor.u32 1.1754944e-38, %v708_v22  ;;  %vm707_vm15 = vcmp.eq.f32.partialorder %v706_v48, 8.507059e+37 }
 0x1c3   :  { %v684_v40 = vsub.f32 1.0, %v683_v29  ;;  %v2448_v29 = vpop.f32.mrf.mxu0 }
 0x1c4   :  { %2933 = vst [vmem:[#allocation32_spill] sm:$0xff] %v2448_v29 }
 0x1c5   :  { %v685_v26 = vmul.f32 %v1544_v42, %v684_v40  ;;  %v2451_v40 = vld [vmem:[#allocation10 + $0x140] sm:$0xff] }
 0x1c6   :  { %v1546_v54 = vpop.eup %1545 }
 0x1c7   :  { %v698_v33 = vmul.f32 %v1546_v54, %v681_v38  ;;  %v686_v51 = vadd.f32 %v1544_v42, %v685_v26  ;;  %vm703_vm12 = vweird.f32 %v1546_v54  ;;  %v2438_v38 = vld [vmem:[#allocation10 + $0x168] sm:$0xff]  ;;  %v2461_v26 = vld [vmem:[#allocation10 + $0x120] sm:$0xff] }
 0x1c8   :  { %vm704_vm14 = vmor %vm702_vm13, %vm703_vm12 }
 0x1c9   :  { %v699_v1 = vsub.f32 1.0, %v698_v33  ;;  %v690_v49 = vsel %vm689_vm10, %v1544_v42, %v686_v51  ;;  %v2445_v42 = vld [vmem:[#allocation10 + $0x150] sm:$0xff]  ;;  %v2491_v51 = vld [vmem:[#allocation10 + $0xc0] sm:$0xff] }
 0x1ca   :  { %v695_v31 = vsel %vm692_vm11, %v694_v16, %v690_v49  ;;  %v2498_v16 = vld [vmem:[#allocation10 + $0xa8] sm:$0xff] }
 0x1cb   :  { %v712_v47 = vmul.f32 %v695_v31, %v670_v28  ;;  %v700_v11 = vmul.f32 %v1546_v54, %v699_v1  ;;  %v2485_v33 = vpop.f32.mrf.mxu0  ;;  %v2505_v1 = vld [vmem:[#allocation10 + $0x90] sm:$0xff]  ;;  %v2512_v28 = vld [vmem:[#allocation10 + $0x78] sm:$0xff]  ;;  %v2945_v31 = vld [vmem:[#allocation40_spill] sm:$0xff] }
 0x1cc   :  { %2934 = vst [vmem:[#allocation22_spill] sm:$0xff] %v2485_v33 }
 0x1cd   :  { %v713_v60 = vadd.f32 %v712_v47, %v2932_v53  ;;  %v701_v0 = vadd.f32 %v1546_v54, %v700_v11 }
 0x1cf   :  { %1547 = vtanh.f32 %v713_v60  ;;  %v705_v10 = vsel %vm704_vm14, %v1546_v54, %v701_v0  ;;  %v2475_v54 = vld [vmem:[#allocation10 + $0xf0] sm:$0xff] }
 0x1d0   :  { %v710_v17 = vsel %vm707_vm15, %v709_v14, %v705_v10 }
 0x1d1   :  { %v715_v24 = vsub.f32 1.0, %v710_v17  ;;  %v717_v36 = vmul.f32 %v710_v17, %v2323_v39  ;;  %v2442_v39 = vld [vmem:[#allocation10 + $0x158] sm:$0xff] }
 0x1d3   :  { %v2520_v49 = vpop.f32.mrf.mxu0 }
 0x1d4   :  { %2935 = vst [vmem:[#allocation20_spill] sm:$0xff] %v2520_v49  ;;  %v2658_v49 = vld [vmem:[#allocation10 + $0x8] sm:$0xff] }
 0x1d5   :  { %v1548_v21 = vpop.eup %1547  ;;  %2954 = vst [vmem:[#allocation63_spill] sm:$0xff] %v2658_v49 }
 0x1d6   :  { %v716_v7 = vmul.f32 %v1548_v21, %v715_v24 }
 0x1d8   :  { %v2427_v35 = vadd.f32 %v717_v36, %v716_v7 }
 0x1da   :  { %735 = vmatmul.f32.vlgmr.msra.gmra.mxu0 %v2427_v35  ;;  %755 = vmatmul.f32.vlgmr.msrb.gmra.mxu1 %v2427_v35 }
 0x1db   :  { %775 = vmatmul.f32.vlgmr.msrb.gmra.mxu2 %v2427_v35  ;;  %973 = vmatpush.msra.mxu0 %v2432_v25 }
 0x1dc   :  { %1060 = vmatpush.msrb.mxu2 %v2435_v2  ;;  %1040 = vmatpush.msrb.mxu1 %v2438_v38 }
 0x1dd   :  { %974 = vmatpush.msra.mxu0 %v2015_v9  ;;  %v2458_v9 = vld [vmem:[#allocation10 + $0x128] sm:$0xff] }
 0x1de   :  { %1061 = vmatpush.msrb.mxu2 %v2442_v39  ;;  %1041 = vmatpush.msrb.mxu1 %v2445_v42 }
 0x1df   :  { %975 = vmatpush.msra.mxu0 %v2024_v13  ;;  %v2465_v13 = vld [vmem:[#allocation10 + $0x110] sm:$0xff] }
 0x1e0   :  { %1062 = vmatpush.msrb.mxu2 %v2451_v40  ;;  %1042 = vmatpush.msrb.mxu1 %v2454_v12 }
 0x1e1   :  { %976 = vmatpush.msra.mxu0 %v2037_v18  ;;  %v2472_v18 = vld [vmem:[#allocation10 + $0xf8] sm:$0xff] }
 0x1e2   :  { %1063 = vmatpush.msrb.mxu2 %v2458_v9  ;;  %1043 = vmatpush.msrb.mxu1 %v2461_v26 }
 0x1e3   :  { %977 = vmatpush.msra.mxu0 %v2050_v23  ;;  %v2479_v23 = vld [vmem:[#allocation10 + $0xe0] sm:$0xff] }
 0x1e4   :  { %1064 = vmatpush.msrb.mxu2 %v2465_v13  ;;  %1044 = vmatpush.msrb.mxu1 %v2468_v30 }
 0x1e5   :  { %978 = vmatpush.msra.mxu0 %v2059_v27  ;;  %v2488_v27 = vld [vmem:[#allocation10 + $0xc8] sm:$0xff] }
 0x1e6   :  { %1065 = vmatpush.msrb.mxu2 %v2472_v18  ;;  %1045 = vmatpush.msrb.mxu1 %v2475_v54 }
 0x1e7   :  { %979 = vmatpush.msra.mxu0 %v2072_v32  ;;  %v2495_v32 = vld [vmem:[#allocation10 + $0xb0] sm:$0xff] }
 0x1e8   :  { %1066 = vmatpush.msrb.mxu2 %v2479_v23  ;;  %1046 = vmatpush.msrb.mxu1 %v2482_v34 }
 0x1e9   :  { %980 = vmatpush.msra.mxu0 %v2084_v37  ;;  %v2502_v37 = vld [vmem:[#allocation10 + $0x98] sm:$0xff] }
 0x1ea   :  { %1067 = vmatpush.msrb.mxu2 %v2488_v27  ;;  %1047 = vmatpush.msrb.mxu1 %v2491_v51 }
 0x1eb   :  { %981 = vmatpush.msra.mxu0 %v2094_v41  ;;  %v2509_v41 = vld [vmem:[#allocation10 + $0x80] sm:$0xff] }
 0x1ec   :  { %1068 = vmatpush.msrb.mxu2 %v2495_v32  ;;  %1048 = vmatpush.msrb.mxu1 %v2498_v16 }
 0x1ed   :  { %982 = vmatpush.msra.mxu0 %v2102_v50  ;;  %v2517_v50 = vld [vmem:[#allocation10 + $0x60] sm:$0xff] }
 0x1ee   :  { %1069 = vmatpush.msrb.mxu2 %v2502_v37  ;;  %1049 = vmatpush.msrb.mxu1 %v2505_v1 }
 0x1ef   :  { %983 = vmatpush.msra.mxu0 %v2110_v55  ;;  %v2534_v55 = vpop.f32.mrf.mxu0 }
 0x1f0   :  { %1070 = vmatpush.msrb.mxu2 %v2509_v41  ;;  %1050 = vmatpush.msrb.mxu1 %v2512_v28  ;;  %2936 = vst [vmem:[#allocation34_spill] sm:$0xff] %v2534_v55  ;;  %v2655_v55 = vld [vmem:[#allocation10] sm:$0xff] }
 0x1f1   :  { %984 = vmatpush.msra.mxu0 %v2116_v61  ;;  %2953 = vst [vmem:[#allocation38_spill] sm:$0xff] %v2655_v55 }
 0x1f2   :  { %1071 = vmatpush.msrb.mxu2 %v2914_v58  ;;  %1051 = vmatpush.msrb.mxu1 %v2517_v50 }
 0x1f3   :  { %985 = vmatpush.msra.mxu0 %v2909_v43 }
 0x1f4   :  { %1072 = vmatpush.msrb.mxu2 %v2917_v3  ;;  %1052 = vmatpush.msrb.mxu1 %v2910_v44 }
 0x1f5   :  { %986 = vmatpush.msra.mxu0 %v2912_v52 }
 0x1f6   :  { %1073 = vmatpush.msrb.mxu2 %v2920_v8  ;;  %1053 = vmatpush.msrb.mxu1 %v2913_v56 }
 0x1f7   :  { %987 = vmatpush.msra.mxu0 %v2915_v59  ;;  %v2536_v61 = vpop.f32.mrf.mxu0 }
 0x1f8   :  { %1074 = vmatpush.msrb.mxu2 %v2922_v15  ;;  %1054 = vmatpush.msrb.mxu1 %v2916_v63  ;;  %2937 = vst [vmem:[#allocation24_spill] sm:$0xff] %v2536_v61 }
 0x1f9   :  { %988 = vmatpush.msra.mxu0 %v2918_v4 }
 0x1fa   :  { %1075 = vmatpush.msrb.mxu2 %v2923_v19  ;;  %1055 = vmatpush.msrb.mxu1 %v2919_v6  ;;  %v229_v6 = vadd.f32 %v2421_v45, %v2927_v57 }
 0x1ff   :  { %v2538_v43 = vpop.f32.mrf.mxu0 }
 0x200   :  { %2938 = vst [vmem:[#allocation21_spill] sm:$0xff] %v2538_v43  ;;  %v2955_v43 = vld [vmem:[#allocation43_spill] sm:$0xff] }
 0x207   :  { %v2540_v44 = vpop.f32.mrf.mxu0 }
 0x208   :  { %2939 = vst [vmem:[#allocation35_spill] sm:$0xff] %v2540_v44 }
 0x20f   :  { %v2542_v52 = vpop.f32.mrf.mxu0 }
 0x210   :  { %2940 = vst [vmem:[#allocation26_spill] sm:$0xff] %v2542_v52 }
 0x217   :  { %v2544_v56 = vpop.f32.mrf.mxu0 }
 0x218   :  { %2941 = vst [vmem:[#allocation23_spill] sm:$0xff] %v2544_v56 }
 0x21f   :  { %v2546_v58 = vpop.f32.mrf.mxu0 }
 0x220   :  { %2942 = vst [vmem:[#allocation36_spill] sm:$0xff] %v2546_v58  ;;  %v232_v58 = vadd.f32 %v2424_v46, %v2927_v57 }
 0x227   :  { %v2548_v59 = vpop.f32.mrf.mxu0 }
 0x228   :  { %2943 = vst [vmem:[#allocation29_spill] sm:$0xff] %v2548_v59 }
 0x22f   :  { %v2550_v63 = vpop.f32.mrf.mxu0 }
 0x230   :  { %2944 = vst [vmem:[#allocation25_spill] sm:$0xff] %v2550_v63 }
 0x257   :  { %v736_v3 = vpop.f32.mrf.mxu0  ;;  %v756_v4 = vpop.f32.mrf.mxu1 }
 0x258   :  { %v737_v8 = vadd.f32 %v736_v3, %v2928_v5  ;;  %v757_v15 = vadd.f32 %v756_v4, %v2929_v62 }
 0x25a   :  { %v779_v19 = vadd.f32 %v737_v8, %v229_v6  ;;  %v780_v47 = vadd.f32 %v757_v15, %v2945_v31 }
 0x25c   :  { %v1501_v11 = vmul.f32 -1.442695, %v779_v19  ;;  %v1502_v22 = vmul.f32 -1.442695, %v780_v47 }
 0x25e   :  { %1549 = vpow2.f32 %v1501_v11  ;;  %v776_v4 = vpop.f32.mrf.mxu2 }
 0x25f   :  { %1551 = vpow2.f32 %v1502_v22  ;;  %v777_v19 = vadd.f32 %v776_v4, %v2931_v20 }
 0x264   :  { %v1550_v48 = vpop.eup %1549 }
 0x265   :  { %v1552_v53 = vpop.eup %1551  ;;  %v787_v60 = vadd.f32 1.0, %v1550_v48 }
 0x266   :  { %v788_v0 = vadd.f32 1.0, %v1552_v53 }
 0x267   :  { %1553 = vrcp.f32 %v787_v60  ;;  %v800_v7 = vand.u32 2147483648, %v787_v60  ;;  %v798_v3 = vand.u32 2147483647, %v787_v60  ;;  %vm794_vm1 = vweird.f32 %v787_v60 }
 0x268   :  { %1555 = vrcp.f32 %v788_v0  ;;  %v815_v48 = vand.u32 2147483648, %v788_v0  ;;  %vm809_vm5 = vweird.f32 %v788_v0  ;;  %v813_v53 = vand.u32 2147483647, %v788_v0 }
 0x269   :  { %v801_v15 = vor.u32 1.1754944e-38, %v800_v7  ;;  %vm799_vm3 = vcmp.eq.f32.partialorder %v798_v3, 8.507059e+37 }
 0x26a   :  { %vm814_vm7 = vcmp.eq.f32.partialorder %v813_v53, 8.507059e+37  ;;  %v2625_v53 = vld [vmem:[#allocation10 + $0x58] sm:$0xff] }
 0x26d   :  { %v1554_v10 = vpop.eup %1553 }
 0x26e   :  { %v1556_v14 = vpop.eup %1555  ;;  %v790_v45 = vmul.f32 %v1554_v10, %v787_v60  ;;  %vm795_vm0 = vweird.f32 %v1554_v10 }
 0x26f   :  { %v805_v17 = vmul.f32 %v1556_v14, %v788_v0  ;;  %vm796_vm2 = vmor %vm794_vm1, %vm795_vm0  ;;  %vm810_vm4 = vweird.f32 %v1556_v14  ;;  %v2568_v0 = vld [vmem:[#allocation10 + $0x160] sm:$0xff] }
 0x270   :  { %v791_v24 = vsub.f32 1.0, %v790_v45  ;;  %v2946_v45 = vld [vmem:[#allocation42_spill] sm:$0xff]  ;;  %vm811_vm6 = vmor %vm809_vm5, %vm810_vm4 }
 0x271   :  { %v806_v21 = vsub.f32 1.0, %v805_v17 }
 0x272   :  { %v792_v36 = vmul.f32 %v1554_v10, %v791_v24 }
 0x273   :  { %v807_v6 = vmul.f32 %v1556_v14, %v806_v21  ;;  %v816_v21 = vor.u32 1.1754944e-38, %v815_v48  ;;  %v2622_v48 = vld [vmem:[#allocation10 + $0x68] sm:$0xff] }
 0x274   :  { %v793_v8 = vadd.f32 %v1554_v10, %v792_v36 }
 0x275   :  { %v808_v11 = vadd.f32 %v1556_v14, %v807_v6  ;;  %v2583_v6 = vld [vmem:[#allocation10 + $0x118] sm:$0xff] }
 0x276   :  { %v797_v31 = vsel %vm796_vm2, %v1554_v10, %v793_v8  ;;  %v2588_v8 = vld [vmem:[#allocation10 + $0x100] sm:$0xff] }
 0x277   :  { %v802_v47 = vsel %vm799_vm3, %v801_v15, %v797_v31  ;;  %v812_v24 = vsel %vm811_vm6, %v1556_v14, %v808_v11  ;;  %v2578_v14 = vld [vmem:[#allocation10 + $0x130] sm:$0xff]  ;;  %v2593_v15 = vld [vmem:[#allocation10 + $0xe8] sm:$0xff]  ;;  %v2603_v31 = vld [vmem:[#allocation10 + $0xb8] sm:$0xff] }
 0x278   :  { %v819_v22 = vmul.f32 %v802_v47, %v777_v19  ;;  %v817_v60 = vsel %vm814_vm7, %v816_v21, %v812_v24  ;;  %v2598_v19 = vld [vmem:[#allocation10 + $0xd0] sm:$0xff]  ;;  %v2608_v47 = vld [vmem:[#allocation10 + $0xa0] sm:$0xff]  ;;  %v2613_v11 = vld [vmem:[#allocation10 + $0x88] sm:$0xff] }
 0x279   :  { %v822_v7 = vsub.f32 1.0, %v817_v60  ;;  %v824_v10 = vmul.f32 %v817_v60, %v2427_v35  ;;  %v2573_v35 = vld [vmem:[#allocation10 + $0x148] sm:$0xff]  ;;  %v2634_v24 = vld [vmem:[#allocation10 + $0x40] sm:$0xff]  ;;  %v2637_v21 = vld [vmem:[#allocation10 + $0x30] sm:$0xff] }
 0x27a   :  { %v820_v17 = vadd.f32 %v819_v22, %v2946_v45  ;;  %v2618_v22 = vld [vmem:[#allocation10 + $0x70] sm:$0xff]  ;;  %v2628_v45 = vld [vmem:[#allocation10 + $0x48] sm:$0xff]  ;;  %2947 = vst [vmem:[#allocation27_spill] sm:$0xff] %v2637_v21  ;;  %v2640_v60 = vld [vmem:[#allocation10 + $0x38] sm:$0xff] }
 0x27b   :  { %2948 = vst [vmem:[#allocation28_spill] sm:$0xff] %v2640_v60 }
 0x27c   :  { %1557 = vtanh.f32 %v820_v17  ;;  %v2631_v17 = vld [vmem:[#allocation10 + $0x50] sm:$0xff] }
 0x282   :  { %v1558_v36 = vpop.eup %1557 }
 0x283   :  { %v823_v4 = vmul.f32 %v1558_v36, %v822_v7  ;;  %v2643_v7 = vld [vmem:[#allocation10 + $0x28] sm:$0xff]  ;;  %v2646_v36 = vld [vmem:[#allocation10 + $0x18] sm:$0xff] }
 0x284   :  { %2949 = vst [vmem:[#allocation30_spill] sm:$0xff] %v2643_v7 }
 0x285   :  { %v2560_v3 = vadd.f32 %v824_v10, %v823_v4  ;;  %2950 = vst [vmem:[#allocation31_spill] sm:$0xff] %v2646_v36  ;;  %v2649_v4 = vld [vmem:[#allocation10 + $0x20] sm:$0xff]  ;;  %v2652_v10 = vld [vmem:[#allocation10 + $0x10] sm:$0xff] }
 0x286   :  { %2951 = vst [vmem:[#allocation33_spill] sm:$0xff] %v2649_v4 }
 0x287   :  { %842 = vmatmul.f32.vlgmr.msrb.gmra.mxu3 %v2560_v3  ;;  %862 = vmatmul.f32.vlgmr.msrb.gmra.mxu0 %v2560_v3  ;;  %2952 = vst [vmem:[#allocation37_spill] sm:$0xff] %v2652_v10 }
 0x288   :  { %882 = vmatmul.f32.vlgmr.msra.gmra.mxu1 %v2560_v3  ;;  %1080 = vmatpush.msrb.mxu3 %v2432_v25 }
 0x289   :  { %1147 = vmatpush.msrb.mxu0 %v2438_v38  ;;  %1167 = vmatpush.msra.mxu1 %v2435_v2 }
 0x28a   :  { %1081 = vmatpush.msrb.mxu3 %v2568_v0 }
 0x28b   :  { %1148 = vmatpush.msrb.mxu0 %v2445_v42  ;;  %1168 = vmatpush.msra.mxu1 %v2442_v39 }
 0x28c   :  { %1082 = vmatpush.msrb.mxu3 %v2573_v35 }
 0x28d   :  { %1149 = vmatpush.msrb.mxu0 %v2454_v12  ;;  %1169 = vmatpush.msra.mxu1 %v2451_v40 }
 0x28e   :  { %1083 = vmatpush.msrb.mxu3 %v2578_v14 }
 0x28f   :  { %1150 = vmatpush.msrb.mxu0 %v2461_v26  ;;  %1170 = vmatpush.msra.mxu1 %v2458_v9 }
 0x290   :  { %1084 = vmatpush.msrb.mxu3 %v2583_v6 }
 0x291   :  { %1151 = vmatpush.msrb.mxu0 %v2468_v30  ;;  %1171 = vmatpush.msra.mxu1 %v2465_v13 }
 0x292   :  { %1085 = vmatpush.msrb.mxu3 %v2588_v8 }
 0x293   :  { %1152 = vmatpush.msrb.mxu0 %v2475_v54  ;;  %1172 = vmatpush.msra.mxu1 %v2472_v18 }
 0x294   :  { %1086 = vmatpush.msrb.mxu3 %v2593_v15 }
 0x295   :  { %1153 = vmatpush.msrb.mxu0 %v2482_v34  ;;  %1173 = vmatpush.msra.mxu1 %v2479_v23 }
 0x296   :  { %1087 = vmatpush.msrb.mxu3 %v2598_v19 }
 0x297   :  { %1154 = vmatpush.msrb.mxu0 %v2491_v51  ;;  %1174 = vmatpush.msra.mxu1 %v2488_v27 }
 0x298   :  { %1088 = vmatpush.msrb.mxu3 %v2603_v31 }
 0x299   :  { %1155 = vmatpush.msrb.mxu0 %v2498_v16  ;;  %1175 = vmatpush.msra.mxu1 %v2495_v32 }
 0x29a   :  { %1089 = vmatpush.msrb.mxu3 %v2608_v47 }
 0x29b   :  { %1156 = vmatpush.msrb.mxu0 %v2505_v1  ;;  %1176 = vmatpush.msra.mxu1 %v2502_v37 }
 0x29c   :  { %1090 = vmatpush.msrb.mxu3 %v2613_v11 }
 0x29d   :  { %1157 = vmatpush.msrb.mxu0 %v2512_v28  ;;  %1177 = vmatpush.msra.mxu1 %v2509_v41 }
 0x29e   :  { %1091 = vmatpush.msrb.mxu3 %v2618_v22 }
 0x29f   :  { %1158 = vmatpush.msrb.mxu0 %v2517_v50  ;;  %1178 = vmatpush.msra.mxu1 %v2622_v48 }
 0x2a0   :  { %1092 = vmatpush.msrb.mxu3 %v2625_v53 }
 0x2a1   :  { %1159 = vmatpush.msrb.mxu0 %v2628_v45  ;;  %1179 = vmatpush.msra.mxu1 %v2631_v17 }
 0x2a2   :  { %1093 = vmatpush.msrb.mxu3 %v2634_v24 }
 0x2a3   :  { %1160 = vmatpush.msrb.mxu0 %v2637_v21  ;;  %1180 = vmatpush.msra.mxu1 %v2640_v60 }
 0x2a4   :  { %1094 = vmatpush.msrb.mxu3 %v2643_v7 }
 0x2a5   :  { %1161 = vmatpush.msrb.mxu0 %v2646_v36  ;;  %1181 = vmatpush.msra.mxu1 %v2649_v4 }
 0x2a6   :  { %1095 = vmatpush.msrb.mxu3 %v2652_v10 }
 0x2a7   :  { %1162 = vmatpush.msrb.mxu0 %v2655_v55  ;;  %1182 = vmatpush.msra.mxu1 %v2658_v49 }
 0x304   :  { %v863_v33 = vpop.f32.mrf.mxu0 }
 0x305   :  { %v864_v61 = vadd.f32 %v863_v33, %v2929_v62 }
 0x307   :  { %v887_v44 = vadd.f32 %v864_v61, %v2955_v43 }
 0x309   :  { %v1504_v52 = vmul.f32 -1.442695, %v887_v44 }
 0x30a   :  { %v843_v56 = vpop.f32.mrf.mxu3 }
 0x30b   :  { %1559 = vpow2.f32 %v1504_v52  ;;  %v844_v59 = vadd.f32 %v843_v56, %v2928_v5  ;;  %v883_v56 = vpop.f32.mrf.mxu1 }
 0x30d   :  { %v886_v63 = vadd.f32 %v844_v59, %v232_v58 }
 0x30f   :  { %v1503_v29 = vmul.f32 -1.442695, %v886_v63 }
 0x311   :  { %v1560_v55 = vpop.eup %1559  ;;  %1561 = vpow2.f32 %v1503_v29 }
 0x312   :  { %v895_v10 = vadd.f32 1.0, %v1560_v55  ;;  %v884_v55 = vadd.f32 %v883_v56, %v2931_v20 }
 0x314   :  { %1563 = vrcp.f32 %v895_v10  ;;  %v922_v57 = vand.u32 2147483648, %v895_v10  ;;  %vm916_vm13 = vweird.f32 %v895_v10 }
 0x317   :  { %v1562_v49 = vpop.eup %1561 }
 0x318   :  { %v894_v4 = vadd.f32 1.0, %v1562_v49 }
 0x31a   :  { %1565 = vrcp.f32 %v894_v4  ;;  %v1564_v33 = vpop.eup %1563  ;;  %v907_v7 = vand.u32 2147483648, %v894_v4  ;;  %v905_v52 = vand.u32 2147483647, %v894_v4  ;;  %vm901_vm9 = vweird.f32 %v894_v4 }
 0x31b   :  { %v912_v62 = vmul.f32 %v1564_v33, %v895_v10  ;;  %vm917_vm12 = vweird.f32 %v1564_v33 }
 0x31c   :  { %v908_v29 = vor.u32 1.1754944e-38, %v907_v7  ;;  %vm906_vm11 = vcmp.eq.f32.partialorder %v905_v52, 8.507059e+37  ;;  %vm918_vm14 = vmor %vm916_vm13, %vm917_vm12 }
 0x31d   :  { %v913_v44 = vsub.f32 1.0, %v912_v62 }
 0x31f   :  { %v914_v58 = vmul.f32 %v1564_v33, %v913_v44  ;;  %v923_v44 = vor.u32 1.1754944e-38, %v922_v57  ;;  %v2957_v57 = vld [vmem:[#allocation27_spill] sm:$0xff] }
 0x320   :  { %v1566_v61 = vpop.eup %1565 }
 0x321   :  { %v897_v43 = vmul.f32 %v1566_v61, %v894_v4  ;;  %vm902_vm8 = vweird.f32 %v1566_v61  ;;  %v915_v5 = vadd.f32 %v1564_v33, %v914_v58 }
 0x322   :  { %vm903_vm10 = vmor %vm901_vm9, %vm902_vm8 }
 0x323   :  { %v898_v36 = vsub.f32 1.0, %v897_v43  ;;  %v920_v43 = vand.u32 2147483647, %v895_v10  ;;  %v919_v21 = vsel %vm918_vm14, %v1564_v33, %v915_v5  ;;  %v2958_v5 = vld [vmem:[#allocation28_spill] sm:$0xff] }
 0x325   :  { %v899_v46 = vmul.f32 %v1566_v61, %v898_v36  ;;  %v2956_v36 = vld [vmem:[#allocation45_spill] sm:$0xff]  ;;  %vm921_vm15 = vcmp.eq.f32.partialorder %v920_v43, 8.507059e+37 }
 0x326   :  { %v924_v4 = vsel %vm921_vm15, %v923_v44, %v919_v21 }
 0x327   :  { %v900_v59 = vadd.f32 %v1566_v61, %v899_v46  ;;  %v929_v7 = vsub.f32 1.0, %v924_v4 }
 0x329   :  { %v904_v49 = vsel %vm903_vm10, %v1566_v61, %v900_v59  ;;  %v931_v61 = vmul.f32 %v924_v4, %v2560_v3 }
 0x32a   :  { %v909_v63 = vsel %vm906_vm11, %v908_v29, %v904_v49 }
 0x32b   :  { %v926_v62 = vmul.f32 %v909_v63, %v884_v55 }
 0x32d   :  { %v927_v60 = vadd.f32 %v926_v62, %v2956_v36 }
 0x32f   :  { %1567 = vtanh.f32 %v927_v60 }
 0x335   :  { %v1568_v46 = vpop.eup %1567 }
 0x336   :  { %v930_v56 = vmul.f32 %v1568_v46, %v929_v7 }
 0x338   :  { %v2669_v52 = vadd.f32 %v931_v61, %v930_v56  ;;  %v2970_v56 = vld [vmem:[#allocation48_spill] sm:$0xff] }
 0x33a   :  { %949 = vmatmul.f32.vlgmr.msra.gmra.mxu2 %v2669_v52  ;;  %969 = vmatmul.f32.vlgmr.msra.gmra.mxu3 %v2669_v52 }
 0x33b   :  { %989 = vmatmul.f32.vlgmr.msra.gmra.mxu0 %v2669_v52  ;;  %1187 = vmatpush.msra.mxu2 %v2432_v25 }
 0x33c   :  { %1254 = vmatpush.msra.mxu3 %v2438_v38  ;;  %1274 = vmatpush.msra.mxu0 %v2435_v2  ;;  %v2959_v2 = vld [vmem:[#allocation30_spill] sm:$0xff]  ;;  %v2960_v38 = vld [vmem:[#allocation31_spill] sm:$0xff] }
 0x33d   :  { %1188 = vmatpush.msra.mxu2 %v2568_v0 }
 0x33e   :  { %1255 = vmatpush.msra.mxu3 %v2445_v42  ;;  %1275 = vmatpush.msra.mxu0 %v2442_v39  ;;  %v2961_v39 = vld [vmem:[#allocation33_spill] sm:$0xff] }
 0x33f   :  { %1189 = vmatpush.msra.mxu2 %v2573_v35  ;;  %v2962_v42 = vld [vmem:[#allocation37_spill] sm:$0xff] }
 0x340   :  { %1256 = vmatpush.msra.mxu3 %v2454_v12  ;;  %1276 = vmatpush.msra.mxu0 %v2451_v40  ;;  %v2963_v40 = vld [vmem:[#allocation38_spill] sm:$0xff]  ;;  %v2964_v12 = vld [vmem:[#allocation63_spill] sm:$0xff] }
 0x341   :  { %1190 = vmatpush.msra.mxu2 %v2578_v14 }
 0x342   :  { %1257 = vmatpush.msra.mxu3 %v2461_v26  ;;  %1277 = vmatpush.msra.mxu0 %v2458_v9 }
 0x343   :  { %1191 = vmatpush.msra.mxu2 %v2583_v6 }
 0x344   :  { %1258 = vmatpush.msra.mxu3 %v2468_v30  ;;  %1278 = vmatpush.msra.mxu0 %v2465_v13  ;;  %v2965_v13 = vld [vmem:[#allocation56_spill] sm:$0xff] }
 0x345   :  { %1192 = vmatpush.msra.mxu2 %v2588_v8  ;;  %v2966_v30 = vld [vmem:[#allocation32_spill] sm:$0xff] }
 0x346   :  { %1259 = vmatpush.msra.mxu3 %v2475_v54  ;;  %1279 = vmatpush.msra.mxu0 %v2472_v18  ;;  %v235_v18 = vadd.f32 %v2966_v30, %v2965_v13  ;;  %v2967_v54 = vld [vmem:[#allocation58_spill] sm:$0xff] }
 0x347   :  { %1193 = vmatpush.msra.mxu2 %v2593_v15 }
 0x348   :  { %1260 = vmatpush.msra.mxu3 %v2482_v34  ;;  %1280 = vmatpush.msra.mxu0 %v2479_v23  ;;  %v2968_v34 = vld [vmem:[#allocation60_spill] sm:$0xff] }
 0x349   :  { %1194 = vmatpush.msra.mxu2 %v2598_v19 }
 0x34a   :  { %1261 = vmatpush.msra.mxu3 %v2491_v51  ;;  %1281 = vmatpush.msra.mxu0 %v2488_v27 }
 0x34b   :  { %1195 = vmatpush.msra.mxu2 %v2603_v31 }
 0x34c   :  { %1262 = vmatpush.msra.mxu3 %v2498_v16  ;;  %1282 = vmatpush.msra.mxu0 %v2495_v32  ;;  %v2969_v32 = vld [vmem:[#allocation46_spill] sm:$0xff] }
 0x34d   :  { %1196 = vmatpush.msra.mxu2 %v2608_v47 }
 0x34e   :  { %1263 = vmatpush.msra.mxu3 %v2505_v1  ;;  %1283 = vmatpush.msra.mxu0 %v2502_v37 }
 0x34f   :  { %1197 = vmatpush.msra.mxu2 %v2613_v11 }
 0x350   :  { %1264 = vmatpush.msra.mxu3 %v2512_v28  ;;  %1284 = vmatpush.msra.mxu0 %v2509_v41 }
 0x351   :  { %1198 = vmatpush.msra.mxu2 %v2618_v22 }
 0x352   :  { %1265 = vmatpush.msra.mxu3 %v2517_v50  ;;  %1285 = vmatpush.msra.mxu0 %v2622_v48 }
 0x353   :  { %1199 = vmatpush.msra.mxu2 %v2625_v53 }
 0x354   :  { %1266 = vmatpush.msra.mxu3 %v2628_v45  ;;  %1286 = vmatpush.msra.mxu0 %v2631_v17 }
 0x355   :  { %1200 = vmatpush.msra.mxu2 %v2634_v24 }
 0x356   :  { %1267 = vmatpush.msra.mxu3 %v2957_v57  ;;  %1287 = vmatpush.msra.mxu0 %v2958_v5 }
 0x357   :  { %1201 = vmatpush.msra.mxu2 %v2959_v2 }
 0x358   :  { %1268 = vmatpush.msra.mxu3 %v2960_v38  ;;  %1288 = vmatpush.msra.mxu0 %v2961_v39  ;;  %v360_v39 = vld [vmem:[%s2808_s7] sm:$0x3] }
 0x359   :  { %1202 = vmatpush.msra.mxu2 %v2962_v42  ;;  %v362_v30 = vperm.slane %v360_v39, 0 }
 0x35a   :  { %1269 = vmatpush.msra.mxu3 %v2963_v40  ;;  %1289 = vmatpush.msra.mxu0 %v2964_v12 }
 0x3b8   :  { %v990_v29 = vpop.f32.mrf.mxu0 }
 0x3b9   :  { %v991_v62 = vadd.f32 %v990_v29, %v2931_v20 }
 0x3bd   :  { %v950_v9 = vpop.f32.mrf.mxu2  ;;  %v970_v26 = vpop.f32.mrf.mxu3 }
 0x3be   :  { %v951_v23 = vadd.f32 %v950_v9, %v2967_v54  ;;  %v971_v27 = vadd.f32 %v970_v26, %v2968_v34 }
 0x3c0   :  { %v993_v51 = vadd.f32 %v951_v23, %v235_v18  ;;  %v994_v16 = vadd.f32 %v971_v27, %v2969_v32  ;;  %v363_v18 = vperm.slane %v360_v39, 1  ;;  %v2971_v27 = vld [vmem:[#allocation62_spill] sm:$0xff]  ;;  %v2972_v32 = vld [vmem:[#allocation25_spill] sm:$0xff] }
 0x3c2   :  { %v1505_v37 = vmul.f32 -1.442695, %v993_v51  ;;  %v1506_v1 = vmul.f32 -1.442695, %v994_v16  ;;  %v405_v51 = vadd.f32 %v2971_v27, %v362_v30  ;;  %v446_v16 = vadd.f32 %v2972_v32, %v363_v18 }
 0x3c4   :  { %1569 = vpow2.f32 %v1505_v37  ;;  %v2973_v37 = vld [vmem:[#allocation29_spill] sm:$0xff] }
 0x3c5   :  { %1571 = vpow2.f32 %v1506_v1  ;;  %v443_v1 = vadd.f32 %v2973_v37, %v363_v18 }
 0x3ca   :  { %v1570_v41 = vpop.eup %1569 }
 0x3cb   :  { %v1572_v28 = vpop.eup %1571  ;;  %v1001_v50 = vadd.f32 1.0, %v1570_v41 }
 0x3cc   :  { %v1002_v3 = vadd.f32 1.0, %v1572_v28  ;;  %v2975_v28 = vld [vmem:[#allocation36_spill] sm:$0xff] }
 0x3cd   :  { %1573 = vrcp.f32 %v1001_v50  ;;  %v1014_v10 = vand.u32 2147483648, %v1001_v50  ;;  %v1012_v59 = vand.u32 2147483647, %v1001_v50  ;;  %vm1008_vm1 = vweird.f32 %v1001_v50 }
 0x3ce   :  { %1575 = vrcp.f32 %v1002_v3  ;;  %v1029_v4 = vand.u32 2147483648, %v1002_v3  ;;  %vm1023_vm5 = vweird.f32 %v1002_v3  ;;  %v1027_v46 = vand.u32 2147483647, %v1002_v3 }
 0x3cf   :  { %v1015_v63 = vor.u32 1.1754944e-38, %v1014_v10  ;;  %vm1013_vm3 = vcmp.eq.f32.partialorder %v1012_v59, 8.507059e+37 }
 0x3d0   :  { %v1030_v5 = vor.u32 1.1754944e-38, %v1029_v4  ;;  %vm1028_vm7 = vcmp.eq.f32.partialorder %v1027_v46, 8.507059e+37 }
 0x3d3   :  { %v1574_v48 = vpop.eup %1573 }
 0x3d4   :  { %v1576_v45 = vpop.eup %1575  ;;  %v1004_v17 = vmul.f32 %v1574_v48, %v1001_v50  ;;  %vm1009_vm0 = vweird.f32 %v1574_v48  ;;  %v440_v50 = vadd.f32 %v2975_v28, %v363_v18 }
 0x3d5   :  { %v1019_v21 = vmul.f32 %v1576_v45, %v1002_v3  ;;  %vm1010_vm2 = vmor %vm1008_vm1, %vm1009_vm0  ;;  %vm1024_vm4 = vweird.f32 %v1576_v45  ;;  %v2976_v3 = vld [vmem:[#allocation23_spill] sm:$0xff] }
 0x3d6   :  { %v1005_v60 = vsub.f32 1.0, %v1004_v17  ;;  %vm1025_vm6 = vmor %vm1023_vm5, %vm1024_vm4 }
 0x3d7   :  { %v1020_v33 = vsub.f32 1.0, %v1019_v21  ;;  %v2978_v21 = vld [vmem:[#allocation26_spill] sm:$0xff] }
 0x3d8   :  { %v1006_v58 = vmul.f32 %v1574_v48, %v1005_v60  ;;  %v434_v60 = vadd.f32 %v2978_v21, %v363_v18 }
 0x3d9   :  { %v1021_v55 = vmul.f32 %v1576_v45, %v1020_v33 }
 0x3da   :  { %v1007_v49 = vadd.f32 %v1574_v48, %v1006_v58  ;;  %v2981_v58 = vld [vmem:[#allocation21_spill] sm:$0xff] }
 0x3db   :  { %v1022_v44 = vadd.f32 %v1576_v45, %v1021_v55  ;;  %v428_v59 = vadd.f32 %v2981_v58, %v363_v18  ;;  %v2990_v58 = vld [vmem:[#allocation20_spill] sm:$0xff] }
 0x3dc   :  { %v1011_v43 = vsel %vm1010_vm2, %v1574_v48, %v1007_v49  ;;  %v437_v48 = vadd.f32 %v2976_v3, %v363_v18 }
 0x3dd   :  { %v1016_v36 = vsel %vm1013_vm3, %v1015_v63, %v1011_v43  ;;  %v1026_v57 = vsel %vm1025_vm6, %v1576_v45, %v1022_v44  ;;  %v2977_v45 = vld [vmem:[#allocation57_spill] sm:$0xff] }
 0x3de   :  { %v1033_v7 = vmul.f32 %v1016_v36, %v991_v62  ;;  %v1031_v38 = vsel %vm1028_vm7, %v1030_v5, %v1026_v57  ;;  %v399_v17 = vadd.f32 %v2977_v45, %v362_v30  ;;  %v2988_v44 = vld [vmem:[#allocation49_spill] sm:$0xff] }
 0x3df   :  { %v1036_v40 = vsub.f32 1.0, %v1031_v38  ;;  %v1038_v26 = vmul.f32 %v1031_v38, %v2669_v52  ;;  %v2974_v52 = vld [vmem:[#allocation61_spill] sm:$0xff] }
 0x3e0   :  { %v1034_v61 = vadd.f32 %v1033_v7, %v2970_v56  ;;  %v402_v41 = vadd.f32 %v2974_v52, %v362_v30 }
 0x3e2   :  { %1577 = vtanh.f32 %v1034_v61 }
 0x3e8   :  { %v1578_v12 = vpop.eup %1577 }
 0x3e9   :  { %v1037_v9 = vmul.f32 %v1578_v12, %v1036_v40 }
 0x3eb   :  { %v2733_v23 = vadd.f32 %v1038_v26, %v1037_v9 }
 0x3ed   :  { %1056 = vmatmul.f32.vlgmr.msrb.gmra.mxu1 %v2733_v23  ;;  %1076 = vmatmul.f32.vlgmr.msrb.gmra.mxu2 %v2733_v23 }
 0x3ee   :  { %1096 = vmatmul.f32.vlgmr.msrb.gmra.mxu3 %v2733_v23  ;;  %1369 = vmatpush.xpose.msrb.mxu2 %v405_v51 }
 0x3ef   :  { %1412 = vmatpush.msrb.mxu3 %v446_v16  ;;  %1294 = vmatpush.msrb.mxu1 %v2432_v25  ;;  %v2979_v25 = vld [vmem:[#allocation35_spill] sm:$0xff] }
 0x3f0   :  { %v431_v10 = vadd.f32 %v2979_v25, %v363_v18 }
 0x3f1   :  { %1413 = vmatpush.msrb.mxu3 %v443_v1  ;;  %1295 = vmatpush.msrb.mxu1 %v2568_v0  ;;  %v2980_v0 = vld [vmem:[#allocation53_spill] sm:$0xff] }
 0x3f2   :  { %1370 = vmatpush.xpose.msrb.mxu2 %v402_v41  ;;  %v396_v33 = vadd.f32 %v2980_v0, %v362_v30  ;;  %v2989_v41 = vld [vmem:[#allocation51_spill] sm:$0xff] }
 0x3f3   :  { %1414 = vmatpush.msrb.mxu3 %v440_v50  ;;  %1296 = vmatpush.msrb.mxu1 %v2573_v35  ;;  %v2982_v35 = vld [vmem:[#allocation24_spill] sm:$0xff] }
 0x3f4   :  { %v425_v29 = vadd.f32 %v2982_v35, %v363_v18 }
 0x3f5   :  { %1415 = vmatpush.msrb.mxu3 %v437_v48  ;;  %1297 = vmatpush.msrb.mxu1 %v2578_v14  ;;  %v2983_v14 = vld [vmem:[#allocation50_spill] sm:$0xff] }
 0x3f6   :  { %1371 = vmatpush.xpose.msrb.mxu2 %v399_v17  ;;  %v393_v55 = vadd.f32 %v2983_v14, %v362_v30 }
 0x3f7   :  { %1416 = vmatpush.msrb.mxu3 %v434_v60  ;;  %1298 = vmatpush.msrb.mxu1 %v2583_v6  ;;  %v2984_v6 = vld [vmem:[#allocation47_spill] sm:$0xff] }
 0x3f8   :  { %v390_v49 = vadd.f32 %v2984_v6, %v362_v30 }
 0x3f9   :  { %1417 = vmatpush.msrb.mxu3 %v431_v10  ;;  %1299 = vmatpush.msrb.mxu1 %v2588_v8  ;;  %v2985_v8 = vld [vmem:[#allocation44_spill] sm:$0xff] }
 0x3fa   :  { %1372 = vmatpush.xpose.msrb.mxu2 %v396_v33  ;;  %v387_v63 = vadd.f32 %v2985_v8, %v362_v30 }
 0x3fb   :  { %1418 = vmatpush.msrb.mxu3 %v428_v59  ;;  %1300 = vmatpush.msrb.mxu1 %v2593_v15  ;;  %v2986_v15 = vld [vmem:[#allocation41_spill] sm:$0xff]  ;;  %v241_v59 = vadd.f32 %v2990_v58, %v2965_v13 }
 0x3fc   :  { %v384_v62 = vadd.f32 %v2986_v15, %v362_v30 }
 0x3fd   :  { %1419 = vmatpush.msrb.mxu3 %v425_v29  ;;  %1301 = vmatpush.msrb.mxu1 %v2598_v19 }
 0x3fe   :  { %1373 = vmatpush.xpose.msrb.mxu2 %v393_v55  ;;  %v2991_v55 = vld [vmem:[#allocation52_spill] sm:$0xff] }
 0x3ff   :  { %1302 = vmatpush.msrb.mxu1 %v2603_v31  ;;  %v2987_v31 = vld [vmem:[#allocation22_spill] sm:$0xff] }
 0x401   :  { %1303 = vmatpush.msrb.mxu1 %v2608_v47  ;;  %v238_v47 = vadd.f32 %v2987_v31, %v2965_v13 }
 0x402   :  { %1374 = vmatpush.xpose.msrb.mxu2 %v390_v49 }
 0x403   :  { %1304 = vmatpush.msrb.mxu1 %v2613_v11 }
 0x405   :  { %1305 = vmatpush.msrb.mxu1 %v2618_v22 }
 0x406   :  { %1375 = vmatpush.xpose.msrb.mxu2 %v387_v63 }
 0x407   :  { %1306 = vmatpush.msrb.mxu1 %v2625_v53 }
 0x409   :  { %1307 = vmatpush.msrb.mxu1 %v2634_v24 }
 0x40a   :  { %1376 = vmatpush.xpose.msrb.mxu2 %v384_v62 }
 0x40b   :  { %1308 = vmatpush.msrb.mxu1 %v2959_v2 }
 0x40d   :  { %1309 = vmatpush.msrb.mxu1 %v2962_v42 }
 0x46a   :  { %v1057_v19 = vpop.f32.mrf.mxu1 }
 0x46b   :  { %v1058_v11 = vadd.f32 %v1057_v19, %v2967_v54 }
 0x46d   :  { %v1100_v43 = vadd.f32 %v1058_v11, %v238_v47 }
 0x46f   :  { %v1507_v22 = vmul.f32 -1.442695, %v1100_v43 }
 0x470   :  { %v1077_v36 = vpop.f32.mrf.mxu2 }
 0x471   :  { %1579 = vpow2.f32 %v1507_v22  ;;  %v1078_v53 = vadd.f32 %v1077_v36, %v2968_v34  ;;  %v1097_v12 = vpop.f32.mrf.mxu3 }
 0x472   :  { %v1098_v27 = vadd.f32 %v1097_v12, %v2931_v20 }
 0x473   :  { %v1101_v4 = vadd.f32 %v1078_v53, %v2988_v44 }
 0x475   :  { %v1508_v24 = vmul.f32 -1.442695, %v1101_v4 }
 0x477   :  { %v1580_v7 = vpop.eup %1579  ;;  %1581 = vpow2.f32 %v1508_v24 }
 0x478   :  { %v1108_v2 = vadd.f32 1.0, %v1580_v7 }
 0x47a   :  { %1583 = vrcp.f32 %v1108_v2  ;;  %v1121_v5 = vand.u32 2147483648, %v1108_v2  ;;  %v1119_v39 = vand.u32 2147483647, %v1108_v2  ;;  %vm1115_vm9 = vweird.f32 %v1108_v2 }
 0x47c   :  { %v1122_v30 = vor.u32 1.1754944e-38, %v1121_v5  ;;  %vm1120_vm11 = vcmp.eq.f32.partialorder %v1119_v39, 8.507059e+37  ;;  %v2992_v39 = vld [vmem:[#allocation54_spill] sm:$0xff] }
 0x47d   :  { %v1582_v42 = vpop.eup %1581 }
 0x47e   :  { %v1109_v46 = vadd.f32 1.0, %v1582_v42 }
 0x480   :  { %v1584_v56 = vpop.eup %1583  ;;  %1585 = vrcp.f32 %v1109_v46  ;;  %v1136_v1 = vand.u32 2147483648, %v1109_v46  ;;  %v1134_v52 = vand.u32 2147483647, %v1109_v46  ;;  %vm1130_vm13 = vweird.f32 %v1109_v46 }
 0x481   :  { %v1111_v61 = vmul.f32 %v1584_v56, %v1108_v2  ;;  %vm1116_vm8 = vweird.f32 %v1584_v56 }
 0x482   :  { %vm1117_vm10 = vmor %vm1115_vm9, %vm1116_vm8  ;;  %v1137_v48 = vor.u32 1.1754944e-38, %v1136_v1  ;;  %vm1135_vm15 = vcmp.eq.f32.partialorder %v1134_v52, 8.507059e+37  ;;  %v2993_v1 = vld [vmem:[#allocation55_spill] sm:$0xff] }
 0x483   :  { %v1112_v57 = vsub.f32 1.0, %v1111_v61 }
 0x485   :  { %v1113_v38 = vmul.f32 %v1584_v56, %v1112_v57 }
 0x486   :  { %v1586_v40 = vpop.eup %1585 }
 0x487   :  { %v1126_v9 = vmul.f32 %v1586_v40, %v1109_v46  ;;  %v1114_v26 = vadd.f32 %v1584_v56, %v1113_v38  ;;  %vm1131_vm12 = vweird.f32 %v1586_v40 }
 0x488   :  { %vm1132_vm14 = vmor %vm1130_vm13, %vm1131_vm12 }
 0x489   :  { %v1127_v18 = vsub.f32 1.0, %v1126_v9  ;;  %v1118_v51 = vsel %vm1117_vm10, %v1584_v56, %v1114_v26 }
 0x48a   :  { %v1123_v32 = vsel %vm1120_vm11, %v1122_v30, %v1118_v51 }
 0x48b   :  { %v1140_v16 = vmul.f32 %v1123_v32, %v1098_v27  ;;  %v1128_v37 = vmul.f32 %v1586_v40, %v1127_v18 }
 0x48d   :  { %v1141_v28 = vadd.f32 %v1140_v16, %v2989_v41  ;;  %v1129_v50 = vadd.f32 %v1586_v40, %v1128_v37 }
 0x48f   :  { %1587 = vtanh.f32 %v1141_v28  ;;  %v1133_v3 = vsel %vm1132_vm14, %v1586_v40, %v1129_v50  ;;  %v2994_v50 = vld [vmem:[#allocation34_spill] sm:$0xff] }
 0x490   :  { %v1138_v45 = vsel %vm1135_vm15, %v1137_v48, %v1133_v3  ;;  %v244_v3 = vadd.f32 %v2994_v50, %v2965_v13 }
 0x491   :  { %v1143_v17 = vsub.f32 1.0, %v1138_v45  ;;  %v1145_v25 = vmul.f32 %v1138_v45, %v2733_v23 }
 0x495   :  { %v1588_v21 = vpop.eup %1587 }
 0x496   :  { %v1144_v60 = vmul.f32 %v1588_v21, %v1143_v17 }
 0x498   :  { %v1146_v10 = vadd.f32 %v1145_v25, %v1144_v60 }
 0x49a   :  { %1163 = vmatmul.f32.vlgmr.msrb.gmra.mxu0 %v1146_v10  ;;  %1183 = vmatmul.f32.vlgmr.msra.gmra.mxu1 %v1146_v10 }
 0x49b   :  { %1203 = vmatmul.f32.vlgmr.msra.gmra.mxu2 %v1146_v10 }
 0x517   :  { %v1164_v0 = vpop.f32.mrf.mxu0  ;;  %v1184_v33 = vpop.f32.mrf.mxu1 }
 0x518   :  { %v1165_v35 = vadd.f32 %v1164_v0, %v2967_v54  ;;  %v1185_v29 = vadd.f32 %v1184_v33, %v2968_v34 }
 0x51a   :  { %v1207_v14 = vadd.f32 %v1165_v35, %v241_v59  ;;  %v1208_v6 = vadd.f32 %v1185_v29, %v2991_v55 }
 0x51c   :  { %v1509_v49 = vmul.f32 -1.442695, %v1207_v14  ;;  %v1510_v8 = vmul.f32 -1.442695, %v1208_v6 }
 0x51e   :  { %1589 = vpow2.f32 %v1509_v49  ;;  %v1204_v4 = vpop.f32.mrf.mxu2 }
 0x51f   :  { %1591 = vpow2.f32 %v1510_v8  ;;  %v1205_v42 = vadd.f32 %v1204_v4, %v2931_v20 }
 0x524   :  { %v1590_v23 = vpop.eup %1589 }
 0x525   :  { %v1592_v63 = vpop.eup %1591  ;;  %v1215_v15 = vadd.f32 1.0, %v1590_v23 }
 0x526   :  { %v1216_v62 = vadd.f32 1.0, %v1592_v63 }
 0x527   :  { %1593 = vrcp.f32 %v1215_v15  ;;  %v1228_v36 = vand.u32 2147483648, %v1215_v15  ;;  %v1226_v44 = vand.u32 2147483647, %v1215_v15  ;;  %vm1222_vm1 = vweird.f32 %v1215_v15 }
 0x528   :  { %1595 = vrcp.f32 %v1216_v62  ;;  %v1243_v5 = vand.u32 2147483648, %v1216_v62  ;;  %vm1237_vm5 = vweird.f32 %v1216_v62  ;;  %v1241_v38 = vand.u32 2147483647, %v1216_v62 }
 0x529   :  { %v1229_v2 = vor.u32 1.1754944e-38, %v1228_v36  ;;  %vm1227_vm3 = vcmp.eq.f32.partialorder %v1226_v44, 8.507059e+37 }
 0x52a   :  { %v1244_v9 = vor.u32 1.1754944e-38, %v1243_v5  ;;  %vm1242_vm7 = vcmp.eq.f32.partialorder %v1241_v38, 8.507059e+37 }
 0x52d   :  { %v1594_v19 = vpop.eup %1593 }
 0x52e   :  { %v1596_v31 = vpop.eup %1595  ;;  %v1218_v47 = vmul.f32 %v1594_v19, %v1215_v15  ;;  %vm1223_vm0 = vweird.f32 %v1594_v19 }
 0x52f   :  { %v1233_v11 = vmul.f32 %v1596_v31, %v1216_v62  ;;  %vm1224_vm2 = vmor %vm1222_vm1, %vm1223_vm0  ;;  %vm1238_vm4 = vweird.f32 %v1596_v31  ;;  %vm1389_vm1 = vcmask 523264  }
 0x530   :  { %v1219_v43 = vsub.f32 1.0, %v1218_v47  ;;  %vm1239_vm6 = vmor %vm1237_vm5, %vm1238_vm4  ;;  %v2995_v47 = vld [vmem:[#allocation59_spill] sm:$0xff] }
 0x531   :  { %v1234_v22 = vsub.f32 1.0, %v1233_v11 }
 0x532   :  { %v1220_v53 = vmul.f32 %v1594_v19, %v1219_v43 }
 0x533   :  { %v1235_v24 = vmul.f32 %v1596_v31, %v1234_v22 }
 0x534   :  { %v1221_v7 = vadd.f32 %v1594_v19, %v1220_v53 }
 0x535   :  { %v1236_v61 = vadd.f32 %v1596_v31, %v1235_v24 }
 0x536   :  { %v1225_v46 = vsel %vm1224_vm2, %v1594_v19, %v1221_v7  ;;  %v1382_v7 = vlaneseq }
 0x537   :  { %v1230_v56 = vsel %vm1227_vm3, %v1229_v2, %v1225_v46  ;;  %v1240_v12 = vsel %vm1239_vm6, %v1596_v31, %v1236_v61 }
 0x538   :  { %v1247_v57 = vmul.f32 %v1230_v56, %v1205_v42  ;;  %v1245_v26 = vsel %vm1242_vm7, %v1244_v9, %v1240_v12  ;;  %v1383_v2 = vand.u32 127, %v1382_v7  ;;  %v1385_v42 = vshrl.u32 %v1382_v7, 7 }
 0x539   :  { %v1250_v30 = vsub.f32 1.0, %v1245_v26  ;;  %v1252_v51 = vmul.f32 %v1245_v26, %v1146_v10  ;;  %v1440_v26 = vld [vmem:[#allocation13 + $0x78] sm:$0xff] }
 0x53a   :  { %v1248_v40 = vadd.f32 %v1247_v57, %v2992_v39  ;;  %v1386_v46 = vand.u32 7, %v1383_v2 }
 0x53c   :  { %1597 = vtanh.f32 %v1248_v40  ;;  %vm1387_vm0 = vcmp.eq.s32.totalorder %v1386_v46, %v1385_v42 }
 0x542   :  { %v1598_v18 = vpop.eup %1597 }
 0x543   :  { %v1251_v27 = vmul.f32 %v1598_v18, %v1250_v30  ;;  %v1439_v30 = vld [vmem:[#allocation13 + $0x70] sm:$0xff]  ;;  %v1438_v18 = vld [vmem:[#allocation13 + $0x68] sm:$0xff] }
 0x545   :  { %v1253_v32 = vadd.f32 %v1252_v51, %v1251_v27  ;;  %v1437_v27 = vld [vmem:[#allocation13 + $0x60] sm:$0xff]  ;;  %v1436_v51 = vld [vmem:[#allocation13 + $0x58] sm:$0xff] }
 0x547   :  { %1270 = vmatmul.f32.vlgmr.msra.gmra.mxu3 %v1253_v32  ;;  %1290 = vmatmul.f32.vlgmr.msra.gmra.mxu0 %v1253_v32 }
 0x548   :  { %1310 = vmatmul.f32.vlgmr.msrb.gmra.mxu1 %v1253_v32  ;;  %1445 = vmatpush.msra.mxu3 %v1440_v26 }
 0x54a   :  { %1446 = vmatpush.msra.mxu3 %v1439_v30 }
 0x54c   :  { %1447 = vmatpush.msra.mxu3 %v1438_v18 }
 0x54e   :  { %1448 = vmatpush.msra.mxu3 %v1437_v27 }
 0x550   :  { %1449 = vmatpush.msra.mxu3 %v1436_v51 }
 0x5c4   :  { %v1291_v16 = vpop.f32.mrf.mxu0 }
 0x5c5   :  { %v1292_v37 = vadd.f32 %v1291_v16, %v2968_v34  ;;  %v1434_v16 = vld [vmem:[#allocation13 + $0x48] sm:$0xff] }
 0x5c7   :  { %v1315_v52 = vadd.f32 %v1292_v37, %v2993_v1  ;;  %v1433_v37 = vld [vmem:[#allocation13 + $0x40] sm:$0xff]  ;;  %v1432_v1 = vld [vmem:[#allocation13 + $0x38] sm:$0xff] }
 0x5c9   :  { %v1512_v41 = vmul.f32 -1.442695, %v1315_v52  ;;  %v1431_v52 = vld [vmem:[#allocation13 + $0x30] sm:$0xff] }
 0x5ca   :  { %v1271_v28 = vpop.f32.mrf.mxu3 }
 0x5cb   :  { %1599 = vpow2.f32 %v1512_v41  ;;  %v1272_v48 = vadd.f32 %v1271_v28, %v2967_v54  ;;  %v1311_v54 = vpop.f32.mrf.mxu1  ;;  %v1430_v41 = vld [vmem:[#allocation13 + $0x28] sm:$0xff]  ;;  %v1429_v28 = vld [vmem:[#allocation13 + $0x20] sm:$0xff] }
 0x5cc   :  { %v1312_v8 = vadd.f32 %v1311_v54, %v2931_v20 }
 0x5cd   :  { %v1314_v45 = vadd.f32 %v1272_v48, %v244_v3  ;;  %v1428_v3 = vld [vmem:[#allocation13 + $0x18] sm:$0xff]  ;;  %v1427_v48 = vld [vmem:[#allocation13 + $0x10] sm:$0xff] }
 0x5cf   :  { %v1511_v17 = vmul.f32 -1.442695, %v1314_v45 }
 0x5d1   :  { %v1600_v21 = vpop.eup %1599  ;;  %1601 = vpow2.f32 %v1511_v17 }
 0x5d2   :  { %v1323_v60 = vadd.f32 1.0, %v1600_v21  ;;  %v1426_v21 = vld [vmem:[#allocation13 + $0x8] sm:$0xff] }
 0x5d4   :  { %1603 = vrcp.f32 %v1323_v60  ;;  %v1350_v62 = vand.u32 2147483648, %v1323_v60  ;;  %vm1344_vm13 = vweird.f32 %v1323_v60  ;;  %v1348_v31 = vand.u32 2147483647, %v1323_v60 }
 0x5d6   :  { %v1351_v22 = vor.u32 1.1754944e-38, %v1350_v62  ;;  %vm1349_vm15 = vcmp.eq.f32.partialorder %v1348_v31, 8.507059e+37 }
 0x5d7   :  { %v1602_v25 = vpop.eup %1601 }
 0x5d8   :  { %v1322_v10 = vadd.f32 1.0, %v1602_v25 }
 0x5da   :  { %1605 = vrcp.f32 %v1322_v10  ;;  %v1604_v34 = vpop.eup %1603  ;;  %v1335_v29 = vand.u32 2147483648, %v1322_v10  ;;  %v1333_v14 = vand.u32 2147483647, %v1322_v10  ;;  %vm1329_vm9 = vweird.f32 %v1322_v10 }
 0x5db   :  { %v1340_v0 = vmul.f32 %v1604_v34, %v1323_v60  ;;  %vm1345_vm12 = vweird.f32 %v1604_v34  ;;  %v1425_v60 = vld [vmem:[#allocation13] sm:$0xff] }
 0x5dc   :  { %v1336_v49 = vor.u32 1.1754944e-38, %v1335_v29  ;;  %vm1334_vm11 = vcmp.eq.f32.partialorder %v1333_v14, 8.507059e+37  ;;  %vm1346_vm14 = vmor %vm1344_vm13, %vm1345_vm12 }
 0x5dd   :  { %v1341_v59 = vsub.f32 1.0, %v1340_v0 }
 0x5df   :  { %v1342_v55 = vmul.f32 %v1604_v34, %v1341_v59 }
 0x5e0   :  { %v1606_v33 = vpop.eup %1605 }
 0x5e1   :  { %v1325_v58 = vmul.f32 %v1606_v33, %v1322_v10  ;;  %vm1330_vm8 = vweird.f32 %v1606_v33  ;;  %v1343_v15 = vadd.f32 %v1604_v34, %v1342_v55 }
 0x5e2   :  { %vm1331_vm10 = vmor %vm1329_vm9, %vm1330_vm8 }
 0x5e3   :  { %v1326_v35 = vsub.f32 1.0, %v1325_v58  ;;  %v1347_v43 = vsel %vm1346_vm14, %v1604_v34, %v1343_v15  ;;  %v1528_v34 = vld [vmem:[%s2810_s9] ss:$0 sm:$0xff] }
 0x5e4   :  { %v1352_v36 = vsel %vm1349_vm15, %v1351_v22, %v1347_v43 }
 0x5e5   :  { %v1327_v13 = vmul.f32 %v1606_v33, %v1326_v35  ;;  %v1357_v53 = vsub.f32 1.0, %v1352_v36  ;;  %v1359_v4 = vmul.f32 %v1352_v36, %v1253_v32  ;;  %v1435_v32 = vld [vmem:[#allocation13 + $0x50] sm:$0xff] }
 0x5e6   :  { %1450 = vmatpush.msra.mxu3 %v1435_v32 }
 0x5e7   :  { %v1328_v6 = vadd.f32 %v1606_v33, %v1327_v13 }
 0x5e8   :  { %1451 = vmatpush.msra.mxu3 %v1434_v16 }
 0x5e9   :  { %v1332_v23 = vsel %vm1331_vm10, %v1606_v33, %v1328_v6 }
 0x5ea   :  { %v1337_v63 = vsel %vm1334_vm11, %v1336_v49, %v1332_v23  ;;  %1452 = vmatpush.msra.mxu3 %v1433_v37 }
 0x5eb   :  { %v1354_v19 = vmul.f32 %v1337_v63, %v1312_v8 }
 0x5ec   :  { %1453 = vmatpush.msra.mxu3 %v1432_v1 }
 0x5ed   :  { %v1355_v11 = vadd.f32 %v1354_v19, %v2995_v47 }
 0x5ee   :  { %1454 = vmatpush.msra.mxu3 %v1431_v52 }
 0x5ef   :  { %1607 = vtanh.f32 %v1355_v11 }
 0x5f0   :  { %1455 = vmatpush.msra.mxu3 %v1430_v41 }
 0x5f2   :  { %1456 = vmatpush.msra.mxu3 %v1429_v28 }
 0x5f4   :  { %1457 = vmatpush.msra.mxu3 %v1428_v3 }
 0x5f5   :  { %v1608_v44 = vpop.eup %1607 }
 0x5f6   :  { %v1358_v20 = vmul.f32 %v1608_v44, %v1357_v53  ;;  %1458 = vmatpush.msra.mxu3 %v1427_v48 }
 0x5f8   :  { %v1360_v24 = vadd.f32 %v1359_v4, %v1358_v20  ;;  %1459 = vmatpush.msra.mxu3 %v1426_v21 }
 0x5fa   :  { %1377 = vmatmul.f32.vlgmr.msrb.gmra.mxu2 %v1360_v24  ;;  %1460 = vmatpush.msra.mxu3 %v1425_v60 }
 0x67d   :  { %v1378_v56 = vpop.f32.mrf.mxu2 }
 0x67e   :  { %v1381_v61 = vmul.f32 0.20412415, %v1378_v56 }
 0x680   :  { %v1388_v57 = vsel %vm1387_vm0, %v1381_v61, -1e+30 }
 0x681   :  { %v1390_v5 = vsel %vm1389_vm1, %v1388_v57, -inf }
 0x682   :  { %1391 = vmax.xlane.f32.xlu0 %v1390_v5 }
 0x6f5   :  { %v1392_v38 = vpop.xlane.xlu0 %1391 }
 0x6f6   :  { %v1393_v39 = vsub.f32 %v1388_v57, %v1392_v38 }
 0x6f8   :  { %v1394_v40 = vmul.f32 1.442695, %v1393_v39 }
 0x6fa   :  { %1609 = vpow2.f32 %v1394_v40 }
 0x700   :  { %v1610_v12 = vpop.eup %1609 }
 0x701   :  { %v1396_v9 = vsel %vm1389_vm1, %v1610_v12, 0.0 }
 0x702   :  { %1397 = vadd.xlane.f32.xlu0 %v1396_v9 }
 0x775   :  { %v1398_v50 = vpop.xlane.xlu0 %1397 }
 0x776   :  { %1611 = vrcp.f32 %v1398_v50 }
 0x77c   :  { %v1612_v45 = vpop.eup %1611 }
 0x77d   :  { %v1400_v17 = vmul.f32 %v1612_v45, %v1610_v12 }
 0x77f   :  { %1513 = vmatmul.msk.f32.vlgmr.msrb.gmra.mxu3 %vm1389_vm1, %v1400_v17 }
 0x802   :  { %v1421_v25 = vpop.f32.mrf.mxu3 }
 0x803   :  { %v1424_v10 = vmax.f32 %v1421_v25, 0.0 }
 0x805   :  { %1461 = vmatmul.f32.vlgmr.msra.gmra.mxu3 %v1424_v10 }
 0x888   :  { %v1462_v0 = vpop.f32.mrf.mxu3 }
 0x889   :  { %v1463_v33 = vadd.f32 %v1528_v34, %v1462_v0 }
 0x88b   :  { %1465 = vmax.xlane.f32.xlu1 %v1463_v33 }
 0x8fe   :  { %v1466_v58 = vpop.xlane.xlu1 %1465 }
 0x8ff   :  { %v1467_v59 = vsub.f32 %v1463_v33, %v1466_v58 }
 0x901   :  { %v1468_v35 = vmul.f32 1.442695, %v1467_v59 }
 0x903   :  { %1613 = vpow2.f32 %v1468_v35 }
 0x909   :  { %v1614_v29 = vpop.eup %1613 }
 0x90a   :  { %1470 = vadd.xlane.f32.xlu1 %v1614_v29 }
 0x97d   :  { %v1471_v13 = vpop.xlane.xlu1 %1470 }
 0x97e   :  { %1615 = vlog2.f32 %v1471_v13 }
 0x984   :  { %v1616_v14 = vpop.eup %1615 }
 0x985   :  { %v1473_v54 = vmul.f32 0.6931472, %v1616_v14 }
 0x987   :  { %v1474_v55 = vadd.f32 %v1473_v54, %v1466_v58 }
 0x989   :  { %v1475_v6 = vsub.f32 %v1463_v33, %v1474_v55 }
 0x98b   :  { %1476 = vst [vmem:[#allocation14] sm:$0xff] %v1475_v6 }
 0x98c   :  { %1487 = dma.vmem_to_hbm [thread:$0]  %s1483_s3, 128, %s1485_s13, [#allocation4]  }
 0x98d   :  { %1865 = dma.done.wait [#allocation4], 128  }
 0x98e   :  { %1866 = vsyncadd [#allocation4], 4294967168 }
 0x98f   :  { %1492 = vsyncpa [#allocation3], 1 }
 0x990   :  { %1493 = vsyncpa [#allocation6], 1 }
 0x991   :  { %1494 = vsyncpa [#allocation9], 1 }
 0x992   :  { %1495 = vsyncpa [#allocation12], 1 }
 0x993   :  { %1496 = vsyncpa [#allocation4], 1 }

</bundles_post_ra>
